<compile_context>
chip_gen: v6e
topology: v6e:2x2x1
jax: 0.10.0
libtpu: 0.0.40
codegen_flags: <defaults>
</compile_context>

<pallas_src>
import functools

import jax
import jax.numpy as jnp
from jax.experimental import pallas as pl
from jax.experimental.pallas import tpu as pltpu

# ----------------------------- model dims ---------------------------------
FRAME = 256        # samples per hubert "conv" frame (stride == kernel size)
FEAT = 64          # hubert semantic feature dim
VOCAB = 128        # semantic token vocabulary size
EMB = 64           # codebook embedding dim for the surrogate decoder
SYNTH = 256        # output samples synthesized per semantic token
MAX_T_TILE = 2048  # ~3 KiB/row double-buffered -> well inside v5e's 16 MiB default


def _round_up(x: int, m: int) -> int:
    return ((x + m - 1) // m) * m


def _bf16_epilogue_ok() -> bool:
    """bf16 VPU/EUP exists on v6e/v7x; v5e and older need the f32 epilogue."""
    try:
        kind = jax.devices()[0].device_kind.lower()
    except Exception:
        return False
    return not any(tag in kind for tag in ("v2", "v3", "v4", "v5"))


def _pick_tile(t: int, cap: int = MAX_T_TILE) -> tuple[int, int]:
    """Return (tile, t_pad): tile is a multiple of 8 dividing t_pad >= t.

    Prefers a tile that divides round_up(t, 8) exactly (no padded tail rows ->
    no post-kernel slice copy) and keeps the grid >= 2 steps so both v7x
    TensorCores are used; falls back to a big tile + padding for awkward T.
    """
    t8 = _round_up(max(t, 1), 8)
    if t8 < 16:
        return 8, t8
    limit = max(8, min(cap, (t8 // 2) // 8 * 8))   # grid >= 2 when possible
    best = 8
    for d in range(8, limit + 1, 8):
        if t8 % d == 0:
            best = d
    if best >= min(128, limit):
        return best, t8
    return limit, _round_up(t8, limit)


# --------------------- fused hubert + tokenize + decode --------------------
def _anonymize_kernel(frames_ref, w1_ref, b1_ref, w2_ref, b2_ref,
                      wdec_ref, bd_ref, out_ref, *, compute_dtype):
    # 1) hubert-like feature extraction: strided conv == frames @ w1, GELU.
    #    Frames arrive as f32 from HBM; the bf16 cast for the MXU is an
    #    in-register VPU convert (no extra HBM pass in the wrapper).
    x = frames_ref[...].astype(jnp.bfloat16)
    h = jnp.dot(x, w1_ref[...], preferred_element_type=jnp.float32)
    # NOTE: tanh-approx GELU + bf16 operands may differ from an exact erf/f32
    # HuBERT near argmax decision boundaries; acceptable for this surrogate.
    h = jax.nn.gelu((h + b1_ref[...]).astype(compute_dtype))   # (T_TILE, FEAT)

    # 2) tokenizer.get_token: vocab logits + greedy argmax.
    #    (temperature scaling is argmax-invariant -> omitted)
    logits = jnp.dot(h.astype(jnp.bfloat16), w2_ref[...],
                     preferred_element_type=jnp.float32)
    logits = logits + b2_ref[...]                               # (T_TILE, VOCAB) f32
    t, v = logits.shape
    m = jnp.max(logits, axis=-1, keepdims=True)
    ids = jax.lax.broadcasted_iota(jnp.int32, (t, v), 1)
    # first index attaining the max == argmax tie-breaking (Mosaic-safe lowering)
    tok = jnp.min(jnp.where(logits == m, ids, v), axis=-1, keepdims=True)
    onehot = (ids == tok).astype(wdec_ref.dtype)                # (T_TILE, VOCAB)

    # 3) surrogate semantic_to_waveform: folded codebook+decoder matmul + tanh.
    frames = jnp.dot(onehot, wdec_ref[...], preferred_element_type=jnp.float32)
    frames = (frames + bd_ref[...]).astype(compute_dtype)
    out_ref[...] = jnp.tanh(frames).astype(out_ref.dtype)


def anonymize_frames(frames, w1, b1, w2, b2, wdec, bd, *, t_tile,
                     compute_dtype=jnp.float32, out_dtype=jnp.bfloat16):
    """frames: (T, FRAME) f32, T a multiple of t_tile.  Returns (T, SYNTH)."""
    t, f = frames.shape
    d = w1.shape[1]
    v = w2.shape[1]
    s = wdec.shape[1]
    assert t % t_tile == 0, (t, t_tile)
    kernel = functools.partial(_anonymize_kernel, compute_dtype=compute_dtype)
    return pl.pallas_call(
        kernel,
        out_shape=jax.ShapeDtypeStruct((t, s), out_dtype),
        grid_spec=pltpu.PrefetchScalarGridSpec(
            num_scalar_prefetch=0,
            grid=(t // t_tile,),
            in_specs=[
                pl.BlockSpec((t_tile, f), lambda i: (i, 0)),   # frames (f32)
                # Constant index_maps: Pallas keeps these weight/bias blocks
                # resident in VMEM across grid steps (no per-step re-DMA).
                pl.BlockSpec((f, d), lambda i: (0, 0)),        # w1
                pl.BlockSpec((1, d), lambda i: (0, 0)),        # b1
                pl.BlockSpec((d, v), lambda i: (0, 0)),        # w2
                pl.BlockSpec((1, v), lambda i: (0, 0)),        # b2
                pl.BlockSpec((v, s), lambda i: (0, 0)),        # folded decoder
                pl.BlockSpec((1, s), lambda i: (0, 0)),        # bd
            ],
            out_specs=pl.BlockSpec((t_tile, s), lambda i: (i, 0)),
        ),
        # No vmem_limit override: defaults (16/32/32 MiB on v5e/v6e/v7x) are
        # ample at MAX_T_TILE, and 64 MiB would be the entire v7x VMEM.
        compiler_params=pltpu.CompilerParams(
            dimension_semantics=("parallel",),
        ),
    )(frames, w1, b1, w2, b2, wdec, bd)


# One jit so pad + framing-reshape fuse with the kernel call and the tail slice
# is only materialized when padding was actually needed.
@functools.partial(
    jax.jit,
    static_argnames=("t", "t_pad", "tile", "compute_dtype", "out_dtype"))
def _frame_and_anonymize(audio_flat, w1, b1, w2, b2, wdec, bd, *,
                         t, t_pad, tile, compute_dtype, out_dtype):
    n = audio_flat.shape[0]
    x = audio_flat.astype(jnp.float32)
    x = jnp.pad(x, (0, t_pad * FRAME - n))       # zero-pad the partial tail frame
    frames = x.reshape(t_pad, FRAME)
    out = anonymize_frames(frames, w1, b1, w2, b2, wdec, bd, t_tile=tile,
                           compute_dtype=compute_dtype, out_dtype=out_dtype)
    if t_pad > t:                                 # skip the copy when exact
        out = out[:t]
    return out.reshape(-1)                        # (t * SYNTH,)


# ------------------------------ module wrapper ------------------------------
class AnonymizerPallas:
    """Synthetic-weight stand-in for Anonymizer (Bark + HuBERT pipeline)."""

    def __init__(self, sample_rate: int = 24000, voice_dirs=None):
        self.sample_rate = sample_rate
        self.voice_dirs = voice_dirs
        k = jax.random.PRNGKey(1234)
        k1, k2, k3, k4 = jax.random.split(k, 4)
        # hubert-like conv (frame -> feature); bf16 operands, f32 accumulate.
        self.w1 = (jax.random.normal(k1, (FRAME, FEAT), jnp.float32)
                   / jnp.sqrt(FRAME)).astype(jnp.bfloat16)
        self.b1 = jnp.zeros((1, FEAT), jnp.float32)
        # tokenizer head (feature -> vocab logits)
        self.w2 = (jax.random.normal(k2, (FEAT, VOCAB), jnp.float32)
                   / jnp.sqrt(FEAT)).astype(jnp.bfloat16)
        self.b2 = jnp.zeros((1, VOCAB), jnp.float32)
        # surrogate decoder, pre-folded: W_dec = codebook @ wd  (VOCAB, SYNTH)
        codebook = jax.random.normal(k3, (VOCAB, EMB), jnp.float32)
        wd = jax.random.normal(k4, (EMB, SYNTH), jnp.float32) / jnp.sqrt(EMB)
        self.wdec = (codebook @ wd).astype(jnp.bfloat16)
        self.bd = jnp.zeros((1, SYNTH), jnp.float32)

    def forward(self, audio, target_voice_id: str = "random",
                coarse_temperature: float = 0.7,
                output_dtype=jnp.bfloat16):
        if not self.voice_dirs:
            assert target_voice_id == "random", (
                "If no voice dirs are given, the target voice must be 'random'.")
        # TODO(synk): load_voice / history_prompt has no Pallas equivalent;
        # 'random' == empty semantic & coarse prompts, so it is a no-op here.
        # NOTE: coarse_temperature only rescales logits ahead of a greedy
        # argmax in this surrogate, so it has no effect and is not applied.

        audio = jnp.asarray(audio).reshape(-1)          # mono waveform (N,)
        n = audio.shape[0]
        t = max(1, -(-n // FRAME))                      # ceil(N / FRAME)
        tile, t_pad = _pick_tile(t)
        compute_dtype = jnp.bfloat16 if _bf16_epilogue_ok() else jnp.float32

        # TODO(synk): Bark's semantic_to_waveform (autoregressive coarse/fine
        # transformer sampling + EnCodec decode) is not expressible as a single
        # feed-forward kernel; surrogate deterministic decode used instead.
        return _frame_and_anonymize(
            audio, self.w1, self.b1, self.w2, self.b2, self.wdec, self.bd,
            t=t, t_pad=t_pad, tile=tile,
            compute_dtype=compute_dtype, out_dtype=output_dtype)


if __name__ == "__main__":
    key = jax.random.PRNGKey(0)
    # deterministic mono waveform: (channels=1, num_samples=512*FRAME)
    # -> T = 512 frames, tile = 256, grid = 2 parallel steps (feeds both
    #    v7x TensorCores; harmless on single-TC v5e/v6e), no tail padding.
    num_samples = 512 * FRAME
    audio = jax.random.normal(key, (1, num_samples), jnp.float32)

    model = AnonymizerPallas()
    out = model.forward(audio, target_voice_id="random", coarse_temperature=0.7)
    out = jax.block_until_ready(out)

    assert out.shape == (num_samples // FRAME * SYNTH,), out.shape
    assert out.dtype == jnp.bfloat16, out.dtype
    assert bool(jnp.all(jnp.isfinite(out.astype(jnp.float32))))
    print("KERNEL_OK")
</pallas_src>

<mosaic_0001>
module attributes {stable_mosaic.version = 11 : i64} {
  func.func @_anonymize_kernel(%arg0: i32, %arg1: memref<256x256xf32, #tpu.memory_space<vmem>>, %arg2: memref<256x64xbf16, #tpu.memory_space<vmem>>, %arg3: memref<1x64xf32, #tpu.memory_space<vmem>>, %arg4: memref<64x128xbf16, #tpu.memory_space<vmem>>, %arg5: memref<1x128xf32, #tpu.memory_space<vmem>>, %arg6: memref<128x256xbf16, #tpu.memory_space<vmem>>, %arg7: memref<1x256xf32, #tpu.memory_space<vmem>>, %arg8: memref<256x256xbf16, #tpu.memory_space<vmem>>) attributes {dimension_semantics = [#tpu.dimension_semantics<parallel>], iteration_bounds = array<i64: 2>, scalar_prefetch = 0 : i64, scratch_operands = 0 : i64, tpu.core_type = #tpu.core_type<tc>, window_params = [{transform_indices = @transform_0, window_bounds = array<i64: 256, 256>}, {pipeline_mode = #tpu.pipeline_mode<synchronous>, transform_indices = @transform_1, window_bounds = array<i64: 256, 64>}, {pipeline_mode = #tpu.pipeline_mode<synchronous>, transform_indices = @transform_2, window_bounds = array<i64: 1, 64>}, {pipeline_mode = #tpu.pipeline_mode<synchronous>, transform_indices = @transform_3, window_bounds = array<i64: 64, 128>}, {pipeline_mode = #tpu.pipeline_mode<synchronous>, transform_indices = @transform_4, window_bounds = array<i64: 1, 128>}, {pipeline_mode = #tpu.pipeline_mode<synchronous>, transform_indices = @transform_5, window_bounds = array<i64: 128, 256>}, {pipeline_mode = #tpu.pipeline_mode<synchronous>, transform_indices = @transform_6, window_bounds = array<i64: 1, 256>}, {transform_indices = @transform_7, window_bounds = array<i64: 256, 256>}]} {
    %c0 = arith.constant 0 : index
    %c0_0 = arith.constant 0 : index
    %0 = vector.load %arg1[%c0, %c0_0] : memref<256x256xf32, #tpu.memory_space<vmem>>, vector<256x256xf32>
    %1 = arith.truncf %0 : vector<256x256xf32> to vector<256x256xbf16>
    %c0_1 = arith.constant 0 : index
    %c0_2 = arith.constant 0 : index
    %2 = vector.load %arg2[%c0_1, %c0_2] : memref<256x64xbf16, #tpu.memory_space<vmem>>, vector<256x64xbf16>
    %cst = arith.constant dense<0.000000e+00> : vector<256x64xf32>
    %3 = tpu.matmul %1, %2, %cst {dimension_numbers = #tpu.dot_dimension_numbers<[1], [0], [0], [1], [0, 0, 1, 1], [], []>} : vector<256x256xbf16>, vector<256x64xbf16>, vector<256x64xf32> -> vector<256x64xf32>
    %c0_3 = arith.constant 0 : index
    %c0_4 = arith.constant 0 : index
    %4 = vector.load %arg3[%c0_3, %c0_4] : memref<1x64xf32, #tpu.memory_space<vmem>>, vector<1x64xf32>
    %5 = vector.broadcast %4 : vector<1x64xf32> to vector<256x64xf32>
    %6 = arith.addf %3, %5 : vector<256x64xf32>
    %7 = arith.truncf %6 : vector<256x64xf32> to vector<256x64xbf16>
    %8 = arith.mulf %7, %7 : vector<256x64xbf16>
    %9 = arith.mulf %7, %8 : vector<256x64xbf16>
    %cst_5 = arith.constant 4.467770e-02 : bf16
    %10 = vector.broadcast %cst_5 : bf16 to vector<256x64xbf16>
    %11 = arith.mulf %10, %9 : vector<256x64xbf16>
    %12 = arith.addf %7, %11 : vector<256x64xbf16>
    %cst_6 = arith.constant 7.968750e-01 : bf16
    %13 = vector.broadcast %cst_6 : bf16 to vector<256x64xbf16>
    %14 = arith.mulf %13, %12 : vector<256x64xbf16>
    %15 = math.tanh %14 : vector<256x64xbf16>
    %cst_7 = arith.constant 1.000000e+00 : bf16
    %16 = vector.broadcast %cst_7 : bf16 to vector<256x64xbf16>
    %17 = arith.addf %16, %15 : vector<256x64xbf16>
    %cst_8 = arith.constant 5.000000e-01 : bf16
    %18 = vector.broadcast %cst_8 : bf16 to vector<256x64xbf16>
    %19 = arith.mulf %18, %17 : vector<256x64xbf16>
    %20 = arith.mulf %7, %19 : vector<256x64xbf16>
    %c0_9 = arith.constant 0 : index
    %c0_10 = arith.constant 0 : index
    %21 = vector.load %arg4[%c0_9, %c0_10] : memref<64x128xbf16, #tpu.memory_space<vmem>>, vector<64x128xbf16>
    %cst_11 = arith.constant dense<0.000000e+00> : vector<256x128xf32>
    %22 = tpu.matmul %20, %21, %cst_11 {dimension_numbers = #tpu.dot_dimension_numbers<[1], [0], [0], [1], [0, 0, 1, 1], [], []>} : vector<256x64xbf16>, vector<64x128xbf16>, vector<256x128xf32> -> vector<256x128xf32>
    %c0_12 = arith.constant 0 : index
    %c0_13 = arith.constant 0 : index
    %23 = vector.load %arg5[%c0_12, %c0_13] : memref<1x128xf32, #tpu.memory_space<vmem>>, vector<1x128xf32>
    %24 = vector.broadcast %23 : vector<1x128xf32> to vector<256x128xf32>
    %25 = arith.addf %22, %24 : vector<256x128xf32>
    %cst_14 = arith.constant dense<0xFF800000> : vector<256xf32>
    %26 = vector.multi_reduction <maximumf>, %25, %cst_14 [1] : vector<256x128xf32> to vector<256xf32>
    %27 = vector.shape_cast %26 : vector<256xf32> to vector<256x1xf32>
    %28 = tpu.iota {dimensions = array<i32: 1>} : vector<256x128xi32>
    %29 = vector.broadcast %27 : vector<256x1xf32> to vector<256x128xf32>
    %30 = arith.cmpf oeq, %25, %29 : vector<256x128xf32>
    %c128_i32 = arith.constant 128 : i32
    %31 = vector.broadcast %c128_i32 : i32 to vector<256x128xi32>
    %32 = arith.select %30, %28, %31 : vector<256x128xi1>, vector<256x128xi32>
    %cst_15 = arith.constant dense<2147483647> : vector<256xi32>
    %33 = vector.multi_reduction <minsi>, %32, %cst_15 [1] : vector<256x128xi32> to vector<256xi32>
    %34 = vector.shape_cast %33 : vector<256xi32> to vector<256x1xi32>
    %35 = vector.broadcast %34 : vector<256x1xi32> to vector<256x128xi32>
    %36 = arith.cmpi eq, %28, %35 : vector<256x128xi32>
    %37 = arith.extui %36 : vector<256x128xi1> to vector<256x128xi32>
    %38 = arith.sitofp %37 : vector<256x128xi32> to vector<256x128xf32>
    %39 = arith.truncf %38 : vector<256x128xf32> to vector<256x128xbf16>
    %c0_16 = arith.constant 0 : index
    %c0_17 = arith.constant 0 : index
    %40 = vector.load %arg6[%c0_16, %c0_17] : memref<128x256xbf16, #tpu.memory_space<vmem>>, vector<128x256xbf16>
    %cst_18 = arith.constant dense<0.000000e+00> : vector<256x256xf32>
    %41 = tpu.matmul %39, %40, %cst_18 {dimension_numbers = #tpu.dot_dimension_numbers<[1], [0], [0], [1], [0, 0, 1, 1], [], []>} : vector<256x128xbf16>, vector<128x256xbf16>, vector<256x256xf32> -> vector<256x256xf32>
    %c0_19 = arith.constant 0 : index
    %c0_20 = arith.constant 0 : index
    %42 = vector.load %arg7[%c0_19, %c0_20] : memref<1x256xf32, #tpu.memory_space<vmem>>, vector<1x256xf32>
    %43 = vector.broadcast %42 : vector<1x256xf32> to vector<256x256xf32>
    %44 = arith.addf %41, %43 : vector<256x256xf32>
    %45 = arith.truncf %44 : vector<256x256xf32> to vector<256x256xbf16>
    %46 = math.tanh %45 : vector<256x256xbf16>
    %c0_21 = arith.constant 0 : index
    %c0_22 = arith.constant 0 : index
    %47 = vector.load %arg8[%c0_21, %c0_22] : memref<256x256xbf16, #tpu.memory_space<vmem>>, vector<256x256xbf16>
    tpu.vector_store %arg8[%c0_21, %c0_22], %46 {strides = array<i32>} : memref<256x256xbf16, #tpu.memory_space<vmem>>, vector<256x256xbf16>,
    return
  }
  func.func @transform_0(%arg0: i32) -> (i32, i32) {
    %c0_i32 = arith.constant 0 : i32
    %c0_i32_0 = arith.constant 0 : i32
    return %arg0, %c0_i32 : i32, i32
  }
  func.func @transform_1(%arg0: i32) -> (i32, i32) {
    %c0_i32 = arith.constant 0 : i32
    %c0_i32_0 = arith.constant 0 : i32
    %c0_i32_1 = arith.constant 0 : i32
    return %c0_i32, %c0_i32_0 : i32, i32
  }
  func.func @transform_2(%arg0: i32) -> (i32, i32) {
    %c0_i32 = arith.constant 0 : i32
    %c0_i32_0 = arith.constant 0 : i32
    %c0_i32_1 = arith.constant 0 : i32
    return %c0_i32, %c0_i32_0 : i32, i32
  }
  func.func @transform_3(%arg0: i32) -> (i32, i32) {
    %c0_i32 = arith.constant 0 : i32
    %c0_i32_0 = arith.constant 0 : i32
    %c0_i32_1 = arith.constant 0 : i32
    return %c0_i32, %c0_i32_0 : i32, i32
  }
  func.func @transform_4(%arg0: i32) -> (i32, i32) {
    %c0_i32 = arith.constant 0 : i32
    %c0_i32_0 = arith.constant 0 : i32
    %c0_i32_1 = arith.constant 0 : i32
    return %c0_i32, %c0_i32_0 : i32, i32
  }
  func.func @transform_5(%arg0: i32) -> (i32, i32) {
    %c0_i32 = arith.constant 0 : i32
    %c0_i32_0 = arith.constant 0 : i32
    %c0_i32_1 = arith.constant 0 : i32
    return %c0_i32, %c0_i32_0 : i32, i32
  }
  func.func @transform_6(%arg0: i32) -> (i32, i32) {
    %c0_i32 = arith.constant 0 : i32
    %c0_i32_0 = arith.constant 0 : i32
    %c0_i32_1 = arith.constant 0 : i32
    return %c0_i32, %c0_i32_0 : i32, i32
  }
  func.func @transform_7(%arg0: i32) -> (i32, i32) {
    %c0_i32 = arith.constant 0 : i32
    %c0_i32_0 = arith.constant 0 : i32
    return %arg0, %c0_i32 : i32, i32
  }
}

</mosaic_0001>

<bundles_post_ra>
// kernel: _frame_and_anonymize.1
= control target key start
LH: loop header
LB: loop body
LE: loop exit
PB: predicated region body
PF: predicated region fallthrough
CT: control target
= control target key end

     0   :  { %s2943_s24 = smov 0   ;;  %s4036_s0 = inlined_call_operand.vmem [shape: f32[512,256], index: 0, kind: input, shape index: {}]   ;;  %s4037_s1 = inlined_call_operand.vmem [shape: bf16[256,64], index: 1, kind: input, shape index: {}]   ;;  %s4038_s2 = inlined_call_operand.vmem [shape: f32[1,64], index: 2, kind: input, shape index: {}]   ;;  %s4039_s3 = inlined_call_operand.vmem [shape: bf16[64,128], index: 3, kind: input, shape index: {}]   ;;  %s4040_s4 = inlined_call_operand.vmem [shape: f32[1,128], index: 4, kind: input, shape index: {}]   ;;  %s4041_s5 = inlined_call_operand.vmem [shape: bf16[128,256], index: 5, kind: input, shape index: {}]   ;;  %s4042_s6 = inlined_call_operand.vmem [shape: f32[1,256], index: 6, kind: input, shape index: {}]   ;;  %s4043_s7 = inlined_call_operand.vmem [shape: bf16[512,256], index: 7, kind: output, shape index: {}]  }
   0x1 LB: > { %s2398_s25 = sadd.s32 4294967295, %s2899_s24   ;;  %p2402_p0 = scmp.ge.s32.totalorder %s2899_s24, 1  ;;  %s2899_s24 = sphi %s2943_s24, %s17_s24  }
   0x2   : > { %p239_p1 = scmp.lt.s32.totalorder %s2899_s24, 3 }
   0x4   : > { %p240_p2 = pnand %p2402_p0, %p239_p1 }
   0x5   : > { %s2403_s28 = sshll.u32 (!%p240_p2), %s2398_s25, 5 }
   0x6   : > { %243 = sbr.rel (%p240_p2) target bundleno = 1330 (0x532), region = 48  ;;  %p274_p3 = scmp.lt.s32.totalorder (!%p240_p2), %s2403_s28, 63 }
   0xb   : > { %v2753_v0 = vld [vmem:[%s4037_s1 + $0x78] sm:$0xff]   ;;  %v2755_v2 = vld [vmem:[%s4037_s1 + $0x70] sm:$0xff]   ;;  %v2757_v4 = vld [vmem:[%s4037_s1 + $0x68] sm:$0xff]   ;;  %s4047_s28 = smov (!%p274_p3, %s2403_s28), 63  ;;  %vm883_vm0 = vcmask 523264  }
   0xc   : > { %v2754_v1 = vld [vmem:[%s4037_s1 + $0x38] sm:$0xff]   ;;  %2563 = vmatprep.subr.bf16.mxu0 %v2753_v0  ;;  %v2756_v3 = vld [vmem:[%s4037_s1 + $0x30] sm:$0xff]   ;;  %v2758_v5 = vld [vmem:[%s4037_s1 + $0x28] sm:$0xff]   ;;  %s2561_s18 = sshll.u32 %s4047_s28, 4  ;;  %s2562_s23 = sshll.u32 %s4047_s28, 3 }
   0xd   : > { %2564 = vmatpush3.bf16.msra.mxu0 %v2754_v1  ;;  %v2759_v6 = vld [vmem:[%s4037_s1 + $0x60] sm:$0xff]   ;;  %v2761_v8 = vld [vmem:[%s4037_s1 + $0x58] sm:$0xff]   ;;  %s2984_s26 = scalar_lea.vmem %s4036_s0, %s2561_s18  ;;  %v2763_v10 = vld [vmem:[%s4037_s1 + $0x50] sm:$0xff]   ;;  %s3943_s29 = scalar_lea.vmem %s4043_s7, %s2562_s23 }
   0xe   : > { %2565 = vmatprep.subr.bf16.mxu0 %v2755_v2  ;;  %v2760_v7 = vld [vmem:[%s4037_s1 + $0x20] sm:$0xff]   ;;  %v2762_v9 = vld [vmem:[%s4037_s1 + $0x18] sm:$0xff]   ;;  %v293_v11 = vld [vmem:[%s2984_s26 + $0x8] sm:$0xff] }
   0xf   : > { %v295_v12 = vld [vmem:[%s2984_s26 + $0x18] sm:$0xff]  ;;  %v2764_v14 = vld [vmem:[%s4037_s1 + $0x10] sm:$0xff]   ;;  %v2765_v15 = vld [vmem:[%s4037_s1 + $0x48] sm:$0xff]  }
  0x10   : > { %v357_v13 = vpack.c.bf16 %v295_v12, %v293_v11  ;;  %v2766_v16 = vld [vmem:[%s4037_s1 + $0x8] sm:$0xff]   ;;  %v2767_v17 = vld [vmem:[%s4037_s1 + $0x40] sm:$0xff]   ;;  %v294_v20 = vld [vmem:[%s2984_s26 + $0x10] sm:$0xff] }
  0x11   : > { %2566 = vmatpush3.bf16.msra.mxu0 %v2756_v3  ;;  %v2768_v18 = vld [vmem:[%s4037_s1] sm:$0xff]   ;;  %v297_v21 = vld [vmem:[%s2984_s26 + $0x28] sm:$0xff]  ;;  %v299_v22 = vld [vmem:[%s2984_s26 + $0x38] sm:$0xff] }
  0x12   : > { %2567 = vmatprep.subr.bf16.mxu0 %v2757_v4  ;;  %555 = vmatprep.mubr.bf16.mxu0 %v357_v13  ;;  %v292_v19 = vld [vmem:[%s2984_s26] sm:$0xff]  ;;  %v359_v24 = vpack.c.bf16 %v299_v22, %v297_v21  ;;  %v2769_v25 = vld [vmem:[%s4039_s3 + $0x18] sm:$0xff]   ;;  %v298_v27 = vld [vmem:[%s2984_s26 + $0x30] sm:$0xff] }
  0x13   : > { %v356_v23 = vpack.c.bf16 %v294_v20, %v292_v19  ;;  %v296_v26 = vld [vmem:[%s2984_s26 + $0x20] sm:$0xff]  ;;  %v301_v28 = vld [vmem:[%s2984_s26 + $0x48] sm:$0xff]  ;;  %v303_v29 = vld [vmem:[%s2984_s26 + $0x58] sm:$0xff]  ;;  %2735 = vmatprep.subr.bf16.mxu1 %v2769_v25 }
  0x14   : > { %2739 = vmatpush3.bf16.msra.mxu1 %v2769_v25  ;;  %v358_v30 = vpack.c.bf16 %v298_v27, %v296_v26  ;;  %v361_v31 = vpack.c.bf16 %v303_v29, %v301_v28  ;;  %v2770_v32 = vld [vmem:[%s4039_s3 + $0x10] sm:$0xff]   ;;  %v2771_v33 = vld [vmem:[%s4039_s3 + $0x8] sm:$0xff]   ;;  %v300_v34 = vld [vmem:[%s2984_s26 + $0x40] sm:$0xff] }
  0x15   : > { %2568 = vmatpush3.bf16.msra.mxu0 %v2758_v5  ;;  %v302_v35 = vld [vmem:[%s2984_s26 + $0x50] sm:$0xff]  ;;  %2736 = vmatprep.subr.bf16.mxu1 %v2770_v32  ;;  %v305_v36 = vld [vmem:[%s2984_s26 + $0x68] sm:$0xff]  ;;  %v307_v37 = vld [vmem:[%s2984_s26 + $0x78] sm:$0xff] }
  0x16   : > { %2569 = vmatprep.subr.bf16.mxu0 %v2759_v6  ;;  %v360_v38 = vpack.c.bf16 %v302_v35, %v300_v34  ;;  %v363_v39 = vpack.c.bf16 %v307_v37, %v305_v36  ;;  %v304_v40 = vld [vmem:[%s2984_s26 + $0x60] sm:$0xff]  ;;  %v306_v41 = vld [vmem:[%s2984_s26 + $0x70] sm:$0xff]  ;;  %v309_v42 = vld [vmem:[%s2984_s26 + $0x88] sm:$0xff] }
  0x17   : > { %v311_v43 = vld [vmem:[%s2984_s26 + $0x98] sm:$0xff]  ;;  %v362_v44 = vpack.c.bf16 %v306_v41, %v304_v40  ;;  %v308_v46 = vld [vmem:[%s2984_s26 + $0x80] sm:$0xff]  ;;  %v310_v47 = vld [vmem:[%s2984_s26 + $0x90] sm:$0xff] }
  0x18   : > { %2740 = vmatpush3.bf16.msra.mxu1 %v2770_v32  ;;  %v365_v45 = vpack.c.bf16 %v311_v43, %v309_v42  ;;  %v313_v48 = vld [vmem:[%s2984_s26 + $0xa8] sm:$0xff]  ;;  %v315_v49 = vld [vmem:[%s2984_s26 + $0xb8] sm:$0xff]  ;;  %v364_v50 = vpack.c.bf16 %v310_v47, %v308_v46  ;;  %v312_v52 = vld [vmem:[%s2984_s26 + $0xa0] sm:$0xff] }
  0x19   : > { %2570 = vmatpush3.bf16.msra.mxu0 %v2760_v7  ;;  %2737 = vmatprep.subr.bf16.mxu1 %v2771_v33  ;;  %v367_v51 = vpack.c.bf16 %v315_v49, %v313_v48  ;;  %v314_v53 = vld [vmem:[%s2984_s26 + $0xb0] sm:$0xff]  ;;  %v317_v54 = vld [vmem:[%s2984_s26 + $0xc8] sm:$0xff]  ;;  %v319_v55 = vld [vmem:[%s2984_s26 + $0xd8] sm:$0xff] }
  0x1a   : > { %2571 = vmatprep.subr.bf16.mxu0 %v2761_v8  ;;  %v366_v56 = vpack.c.bf16 %v314_v53, %v312_v52  ;;  %v369_v57 = vpack.c.bf16 %v319_v55, %v317_v54  ;;  %v316_v58 = vld [vmem:[%s2984_s26 + $0xc0] sm:$0xff]  ;;  %v318_v59 = vld [vmem:[%s2984_s26 + $0xd0] sm:$0xff]  ;;  %v321_v60 = vld [vmem:[%s2984_s26 + $0xe8] sm:$0xff] }
  0x1b   : > { %v323_v61 = vld [vmem:[%s2984_s26 + $0xf8] sm:$0xff]  ;;  %v368_v62 = vpack.c.bf16 %v318_v59, %v316_v58  ;;  %v320_v0 = vld [vmem:[%s2984_s26 + $0xe0] sm:$0xff]  ;;  %v322_v1 = vld [vmem:[%s2984_s26 + $0xf0] sm:$0xff] }
  0x1c   : > { %2741 = vmatpush3.bf16.msra.mxu1 %v2771_v33  ;;  %v371_v63 = vpack.c.bf16 %v323_v61, %v321_v60  ;;  %v325_v2 = vld [vmem:[%s2984_s26 + $0x108] sm:$0xff]  ;;  %v327_v3 = vld [vmem:[%s2984_s26 + $0x118] sm:$0xff]  ;;  %v370_v4 = vpack.c.bf16 %v322_v1, %v320_v0  ;;  %v324_v6 = vld [vmem:[%s2984_s26 + $0x100] sm:$0xff] }
  0x1d   : > { %2572 = vmatpush3.bf16.msra.mxu0 %v2762_v9  ;;  %v373_v5 = vpack.c.bf16 %v327_v3, %v325_v2  ;;  %v326_v7 = vld [vmem:[%s2984_s26 + $0x110] sm:$0xff]  ;;  %v329_v8 = vld [vmem:[%s2984_s26 + $0x128] sm:$0xff]  ;;  %v331_v9 = vld [vmem:[%s2984_s26 + $0x138] sm:$0xff] }
  0x1e   : > { %2573 = vmatprep.subr.bf16.mxu0 %v2763_v10  ;;  %v372_v10 = vpack.c.bf16 %v326_v7, %v324_v6  ;;  %v375_v11 = vpack.c.bf16 %v331_v9, %v329_v8  ;;  %v328_v12 = vld [vmem:[%s2984_s26 + $0x120] sm:$0xff]  ;;  %v330_v13 = vld [vmem:[%s2984_s26 + $0x130] sm:$0xff]  ;;  %v337_v20 = vld [vmem:[%s2984_s26 + $0x168] sm:$0xff] }
  0x1f   : > { %v334_v19 = vld [vmem:[%s2984_s26 + $0x150] sm:$0xff]  ;;  %v339_v21 = vld [vmem:[%s2984_s26 + $0x178] sm:$0xff]  ;;  %v341_v26 = vld [vmem:[%s2984_s26 + $0x188] sm:$0xff] }
  0x20   : > { %v343_v27 = vld [vmem:[%s2984_s26 + $0x198] sm:$0xff]  ;;  %v344_v36 = vld [vmem:[%s2984_s26 + $0x1a0] sm:$0xff]  ;;  %v346_v37 = vld [vmem:[%s2984_s26 + $0x1b0] sm:$0xff] }
  0x21   : > { %2574 = vmatpush3.bf16.msra.mxu0 %v2764_v14  ;;  %v333_v14 = vld [vmem:[%s2984_s26 + $0x148] sm:$0xff]  ;;  %v381_v29 = vpack.c.bf16 %v343_v27, %v341_v26  ;;  %v382_v40 = vpack.c.bf16 %v346_v37, %v344_v36  ;;  %v348_v42 = vld [vmem:[%s2984_s26 + $0x1c0] sm:$0xff]  ;;  %v350_v43 = vld [vmem:[%s2984_s26 + $0x1d0] sm:$0xff] }
  0x22   : > { %2575 = vmatprep.subr.bf16.mxu0 %v2765_v15  ;;  %v335_v15 = vld [vmem:[%s2984_s26 + $0x158] sm:$0xff]  ;;  %v384_v46 = vpack.c.bf16 %v350_v43, %v348_v42  ;;  %v2772_v48 = vld [vmem:[%s4039_s3] sm:$0xff]  }
  0x23   : > { %v352_v49 = vld [vmem:[%s2984_s26 + $0x1e0] sm:$0xff]  ;;  %2738 = vmatprep.subr.bf16.mxu1 %v2772_v48 }
  0x24   : > { %2742 = vmatpush3.bf16.msra.mxu1 %v2772_v48 }
  0x25   : > { %2576 = vmatpush3.bf16.msra.mxu0 %v2766_v16  ;;  %v374_v16 = vpack.c.bf16 %v330_v13, %v328_v12 }
  0x26   : > { %2577 = vmatprep.subr.bf16.mxu0 %v2767_v17  ;;  %v377_v17 = vpack.c.bf16 %v335_v15, %v333_v14 }
  0x29   : > { %2578 = vmatpush3.bf16.msra.mxu0 %v2768_v18  ;;  %v332_v18 = vld [vmem:[%s2984_s26 + $0x140] sm:$0xff] }
  0x2a   : > { %2695 = vmatprep.subr.bf16.mxu0 %v2769_v25  ;;  %v376_v22 = vpack.c.bf16 %v334_v19, %v332_v18 }
  0x2c   : > { %556 = vmatmul.mubr.bf16.vlgmr.msra.gmra.mxu0 %v356_v23  ;;  %v379_v23 = vpack.c.bf16 %v339_v21, %v337_v20 }
  0x2d   : > { %563 = vmatprep.mubr.bf16.mxu0 %v359_v24  ;;  %2696 = vmatpush3.bf16.msra.mxu0 %v2769_v25  ;;  %v336_v24 = vld [vmem:[%s2984_s26 + $0x160] sm:$0xff]  ;;  %v338_v25 = vld [vmem:[%s2984_s26 + $0x170] sm:$0xff] }
  0x2e   : > { %2697 = vmatprep.subr.bf16.mxu0 %v2770_v32  ;;  %v378_v28 = vpack.c.bf16 %v338_v25, %v336_v24 }
  0x31   : > { %2698 = vmatpush3.bf16.msra.mxu0 %v2770_v32  ;;  %v345_v32 = vld [vmem:[%s2984_s26 + $0x1a8] sm:$0xff] }
  0x32   : > { %2699 = vmatprep.subr.bf16.mxu0 %v2771_v33 }
  0x34   : > { %564 = vmatmul.mubr.bf16.gmra.mxu0 %v358_v30  ;;  %v340_v30 = vld [vmem:[%s2984_s26 + $0x180] sm:$0xff] }
  0x35   : > { %571 = vmatprep.mubr.bf16.mxu0 %v361_v31  ;;  %2700 = vmatpush3.bf16.msra.mxu0 %v2771_v33  ;;  %v342_v31 = vld [vmem:[%s2984_s26 + $0x190] sm:$0xff]  ;;  %v347_v33 = vld [vmem:[%s2984_s26 + $0x1b8] sm:$0xff] }
  0x36   : > { %v380_v34 = vpack.c.bf16 %v342_v31, %v340_v30  ;;  %v383_v35 = vpack.c.bf16 %v347_v33, %v345_v32  ;;  %2701 = vmatprep.subr.bf16.mxu0 %v2772_v48 }
  0x39   : > { %2702 = vmatpush3.bf16.msra.mxu0 %v2772_v48 }
  0x3c   : > { %572 = vmatmul.mubr.bf16.gmra.mxu0 %v360_v38  ;;  %v349_v38 = vld [vmem:[%s2984_s26 + $0x1c8] sm:$0xff] }
  0x3d   : > { %579 = vmatprep.mubr.bf16.mxu0 %v363_v39  ;;  %v351_v39 = vld [vmem:[%s2984_s26 + $0x1d8] sm:$0xff] }
  0x3e   : > { %v385_v41 = vpack.c.bf16 %v351_v39, %v349_v38 }
  0x44   : > { %580 = vmatmul.mubr.bf16.gmra.mxu0 %v362_v44  ;;  %v353_v44 = vld [vmem:[%s2984_s26 + $0x1e8] sm:$0xff] }
  0x45   : > { %587 = vmatprep.mubr.bf16.mxu0 %v365_v45  ;;  %v355_v45 = vld [vmem:[%s2984_s26 + $0x1f8] sm:$0xff] }
  0x46   : > { %v387_v47 = vpack.c.bf16 %v355_v45, %v353_v44 }
  0x4c   : > { %588 = vmatmul.mubr.bf16.gmra.mxu0 %v364_v50  ;;  %v354_v50 = vld [vmem:[%s2984_s26 + $0x1f0] sm:$0xff] }
  0x4d   : > { %595 = vmatprep.mubr.bf16.mxu0 %v367_v51  ;;  %v386_v51 = vpack.c.bf16 %v354_v50, %v352_v49 }
  0x54   : > { %596 = vmatmul.mubr.bf16.gmra.mxu0 %v366_v56  ;;  %v3086_v56 = vld [vmem:[%s4038_s2] ss:$0 sm:$0xff] }
  0x55   : > { %603 = vmatprep.mubr.bf16.mxu0 %v369_v57 }
  0x5c   : > { %604 = vmatmul.mubr.bf16.gmra.mxu0 %v368_v62 }
  0x5d   : > { %611 = vmatprep.mubr.bf16.mxu0 %v371_v63 }
  0x64   : > { %612 = vmatmul.mubr.bf16.gmra.mxu0 %v370_v4 }
  0x65   : > { %619 = vmatprep.mubr.bf16.mxu0 %v373_v5 }
  0x6c   : > { %620 = vmatmul.mubr.bf16.gmra.mxu0 %v372_v10 }
  0x6d   : > { %627 = vmatprep.mubr.bf16.mxu0 %v375_v11 }
  0x74   : > { %628 = vmatmul.mubr.bf16.gmra.mxu0 %v374_v16 }
  0x75   : > { %635 = vmatprep.mubr.bf16.mxu0 %v377_v17 }
  0x7c   : > { %636 = vmatmul.mubr.bf16.gmra.mxu0 %v376_v22 }
  0x7d   : > { %643 = vmatprep.mubr.bf16.mxu0 %v379_v23 }
  0x84   : > { %644 = vmatmul.mubr.bf16.gmra.mxu0 %v378_v28 }
  0x85   : > { %651 = vmatprep.mubr.bf16.mxu0 %v381_v29 }
  0x8c   : > { %652 = vmatmul.mubr.bf16.gmra.mxu0 %v380_v34 }
  0x8d   : > { %659 = vmatprep.mubr.bf16.mxu0 %v383_v35 }
  0x94   : > { %660 = vmatmul.mubr.bf16.gmra.mxu0 %v382_v40 }
  0x95   : > { %667 = vmatprep.mubr.bf16.mxu0 %v385_v41 }
  0x9c   : > { %668 = vmatmul.mubr.bf16.gmra.mxu0 %v384_v46 }
  0x9d   : > { %675 = vmatprep.mubr.bf16.mxu0 %v387_v47 }
  0xa4   : > { %676 = vmatmul.mubr.bf16.gmra.mxu0 %v386_v51 }
  0xec   : > { %v2579_v52 = vpop.f32.mrf.mxu0 }
  0xee   : > { %v2580_v53 = vpop.f32.mrf.mxu0 }
  0xef   : > { %v2581_v55 = vadd.f32 %v2580_v53, %v2579_v52 }
  0xf0   : > { %v2582_v54 = vpop.f32.mrf.mxu0 }
  0xf1   : > { %v558_v60 = vadd.f32 %v2581_v55, %v3086_v56 }
  0xf2   : > { %v2583_v57 = vpop.f32.mrf.mxu0 }
  0xf3   : > { %v2584_v58 = vadd.f32 %v2583_v57, %v2582_v54 }
  0xf4   : > { %v2585_v59 = vpop.f32.mrf.mxu0 }
  0xf5   : > { %v561_v61 = vadd.f32 %v2584_v58, %v3086_v56 }
  0xf6   : > { %v2586_v62 = vpop.f32.mrf.mxu0 }
  0xf7   : > { %v3090_v63 = vpack.c.bf16 %v561_v61, %v558_v60  ;;  %v2587_v2 = vadd.f32 %v2586_v62, %v2585_v59 }
  0xf8   : > { %v2588_v0 = vpop.f32.mrf.mxu0 }
  0xf9   : > { %v700_v1 = vmul.bf16 %v3090_v63, %v3090_v63  ;;  %v566_v8 = vadd.f32 %v2587_v2, %v3086_v56 }
  0xfa   : > { %v2589_v3 = vpop.f32.mrf.mxu0 }
  0xfb   : > { %v716_v4 = vmul.bf16 %v700_v1, %v3090_v63  ;;  %v2590_v5 = vadd.f32 %v2589_v3, %v2588_v0 }
  0xfc   : > { %v2591_v6 = vpop.f32.mrf.mxu0 }
  0xfd   : > { %v732_v7 = vmul.bf16 1027030327, %v716_v4  ;;  %v569_v9 = vadd.f32 %v2590_v5, %v3086_v56 }
  0xfe   : > { %v2592_v10 = vpop.f32.mrf.mxu0 }
  0xff   : > { %v748_v11 = vadd.bf16 %v732_v7, %v3090_v63  ;;  %v3098_v12 = vpack.c.bf16 %v569_v9, %v566_v8  ;;  %v2593_v16 = vadd.f32 %v2592_v10, %v2591_v6 }
 0x100   : > { %v2594_v13 = vpop.f32.mrf.mxu0 }
 0x101   : > { %v764_v14 = vmul.bf16 1061961548, %v748_v11  ;;  %v701_v15 = vmul.bf16 %v3098_v12, %v3098_v12  ;;  %v574_v22 = vadd.f32 %v2593_v16, %v3086_v56 }
 0x102   : > { %v2595_v17 = vpop.f32.mrf.mxu0 }
 0x103   : > { %2797 = vtanh.bf16 %v764_v14  ;;  %v717_v18 = vmul.bf16 %v701_v15, %v3098_v12  ;;  %v2596_v19 = vadd.f32 %v2595_v17, %v2594_v13 }
 0x104   : > { %v2597_v20 = vpop.f32.mrf.mxu0 }
 0x105   : > { %v733_v21 = vmul.bf16 1027030327, %v717_v18  ;;  %v577_v23 = vadd.f32 %v2596_v19, %v3086_v56 }
 0x106   : > { %v2598_v24 = vpop.f32.mrf.mxu0 }
 0x107   : > { %v749_v25 = vadd.bf16 %v733_v21, %v3098_v12  ;;  %v3106_v26 = vpack.c.bf16 %v577_v23, %v574_v22  ;;  %v2599_v30 = vadd.f32 %v2598_v24, %v2597_v20 }
 0x108   : > { %v2600_v27 = vpop.f32.mrf.mxu0 }
 0x109   : > { %v765_v28 = vmul.bf16 1061961548, %v749_v25  ;;  %v702_v29 = vmul.bf16 %v3106_v26, %v3106_v26  ;;  %v582_v36 = vadd.f32 %v2599_v30, %v3086_v56 }
 0x10a   : > { %v2601_v31 = vpop.f32.mrf.mxu0 }
 0x10b   : > { %2799 = vtanh.bf16 %v765_v28  ;;  %v718_v32 = vmul.bf16 %v702_v29, %v3106_v26  ;;  %v2602_v33 = vadd.f32 %v2601_v31, %v2600_v27 }
 0x10c   : > { %v2603_v34 = vpop.f32.mrf.mxu0 }
 0x10d   : > { %v734_v35 = vmul.bf16 1027030327, %v718_v32  ;;  %v585_v37 = vadd.f32 %v2602_v33, %v3086_v56 }
 0x10e   : > { %v2604_v38 = vpop.f32.mrf.mxu0 }
 0x10f   : > { %v750_v39 = vadd.bf16 %v734_v35, %v3106_v26  ;;  %v3114_v40 = vpack.c.bf16 %v585_v37, %v582_v36  ;;  %v2605_v45 = vadd.f32 %v2604_v38, %v2603_v34 }
 0x110   : > { %v2606_v41 = vpop.f32.mrf.mxu0 }
 0x111   : > { %v2798_v42 = vpop.eup %2797  ;;  %v766_v43 = vmul.bf16 1061961548, %v750_v39  ;;  %v703_v44 = vmul.bf16 %v3114_v40, %v3114_v40  ;;  %v590_v53 = vadd.f32 %v2605_v45, %v3086_v56 }
 0x112   : > { %v2607_v46 = vpop.f32.mrf.mxu0  ;;  %v796_v47 = vadd.bf16 1065369472, %v2798_v42 }
 0x113   : > { %2801 = vtanh.bf16 %v766_v43  ;;  %v719_v48 = vmul.bf16 %v703_v44, %v3114_v40  ;;  %v2608_v49 = vadd.f32 %v2607_v46, %v2606_v41 }
 0x114   : > { %v2609_v50 = vpop.f32.mrf.mxu0  ;;  %v812_v51 = vmul.bf16 1056980736, %v796_v47 }
 0x115   : > { %v735_v52 = vmul.bf16 1027030327, %v719_v48  ;;  %v593_v54 = vadd.f32 %v2608_v49, %v3086_v56 }
 0x116   : > { %v2610_v55 = vpop.f32.mrf.mxu0  ;;  %v828_v57 = vmul.bf16 %v812_v51, %v3090_v63 }
 0x117   : > { %v751_v58 = vadd.bf16 %v735_v52, %v3114_v40  ;;  %v3123_v59 = vpack.c.bf16 %v593_v54, %v590_v53  ;;  %v2611_v1 = vadd.f32 %v2610_v55, %v2609_v50 }
 0x118   : > { %v2612_v60 = vpop.f32.mrf.mxu0  ;;  %2703 = vmatprep.mubr.msk.bf16.mxu0 %vm883_vm0, %v828_v57 }
 0x119   : > { %v2800_v61 = vpop.eup %2799  ;;  %v767_v62 = vmul.bf16 1061961548, %v751_v58  ;;  %v704_v0 = vmul.bf16 %v3123_v59, %v3123_v59  ;;  %v598_v8 = vadd.f32 %v2611_v1, %v3086_v56 }
 0x11a   : > { %v797_v2 = vadd.bf16 1065369472, %v2800_v61  ;;  %v2613_v3 = vpop.f32.mrf.mxu0 }
 0x11b   : > { %2803 = vtanh.bf16 %v767_v62  ;;  %v720_v4 = vmul.bf16 %v704_v0, %v3123_v59  ;;  %v2614_v5 = vadd.f32 %v2613_v3, %v2612_v60 }
 0x11c   : > { %v813_v63 = vmul.bf16 1056980736, %v797_v2  ;;  %v2615_v6 = vpop.f32.mrf.mxu0 }
 0x11d   : > { %v736_v7 = vmul.bf16 1027030327, %v720_v4  ;;  %v601_v9 = vadd.f32 %v2614_v5, %v3086_v56 }
 0x11e   : > { %v829_v10 = vmul.bf16 %v813_v63, %v3098_v12  ;;  %v2616_v11 = vpop.f32.mrf.mxu0 }
 0x11f   : > { %v752_v13 = vadd.bf16 %v736_v7, %v3123_v59  ;;  %v3133_v14 = vpack.c.bf16 %v601_v9, %v598_v8  ;;  %v2617_v19 = vadd.f32 %v2616_v11, %v2615_v6 }
 0x120   : > { %v2618_v15 = vpop.f32.mrf.mxu0  ;;  %2704 = vmatmul.mubr.msk.bf16.vlgmr.msra.gmra.mxu0 %vm883_vm0, %v829_v10 }
 0x121   : > { %v2802_v16 = vpop.eup %2801  ;;  %v768_v17 = vmul.bf16 1061961548, %v752_v13  ;;  %v705_v18 = vmul.bf16 %v3133_v14, %v3133_v14  ;;  %v606_v27 = vadd.f32 %v2617_v19, %v3086_v56 }
 0x122   : > { %v2619_v20 = vpop.f32.mrf.mxu0  ;;  %v798_v21 = vadd.bf16 1065369472, %v2802_v16 }
 0x123   : > { %2805 = vtanh.bf16 %v768_v17  ;;  %v721_v22 = vmul.bf16 %v705_v18, %v3133_v14  ;;  %v2620_v12 = vadd.f32 %v2619_v20, %v2618_v15 }
 0x124   : > { %v2621_v23 = vpop.f32.mrf.mxu0  ;;  %v814_v24 = vmul.bf16 1056980736, %v798_v21 }
 0x125   : > { %v737_v25 = vmul.bf16 1027030327, %v721_v22  ;;  %v609_v28 = vadd.f32 %v2620_v12, %v3086_v56 }
 0x126   : > { %v2622_v29 = vpop.f32.mrf.mxu0  ;;  %v830_v30 = vmul.bf16 %v814_v24, %v3106_v26 }
 0x127   : > { %v753_v31 = vadd.bf16 %v737_v25, %v3133_v14  ;;  %v3143_v32 = vpack.c.bf16 %v609_v28, %v606_v27  ;;  %v2623_v37 = vadd.f32 %v2622_v29, %v2621_v23 }
 0x128   : > { %v2624_v33 = vpop.f32.mrf.mxu0  ;;  %2707 = vmatprep.mubr.msk.bf16.mxu0 %vm883_vm0, %v830_v30 }
 0x129   : > { %v2804_v34 = vpop.eup %2803  ;;  %v769_v35 = vmul.bf16 1061961548, %v753_v31  ;;  %v706_v36 = vmul.bf16 %v3143_v32, %v3143_v32  ;;  %v614_v44 = vadd.f32 %v2623_v37, %v3086_v56 }
 0x12a   : > { %v2625_v38 = vpop.f32.mrf.mxu0  ;;  %v799_v39 = vadd.bf16 1065369472, %v2804_v34 }
 0x12b   : > { %2807 = vtanh.bf16 %v769_v35  ;;  %v2626_v41 = vadd.f32 %v2625_v38, %v2624_v33  ;;  %v722_v42 = vmul.bf16 %v706_v36, %v3143_v32 }
 0x12c   : > { %v2627_v26 = vpop.f32.mrf.mxu0  ;;  %v815_v43 = vmul.bf16 1056980736, %v799_v39 }
 0x12d   : > { %v617_v45 = vadd.f32 %v2626_v41, %v3086_v56  ;;  %v738_v46 = vmul.bf16 1027030327, %v722_v42 }
 0x12e   : > { %v2628_v47 = vpop.f32.mrf.mxu0  ;;  %v831_v48 = vmul.bf16 %v815_v43, %v3114_v40 }
 0x12f   : > { %v3152_v49 = vpack.c.bf16 %v617_v45, %v614_v44  ;;  %v2629_v50 = vadd.f32 %v2628_v47, %v2627_v26  ;;  %v754_v51 = vadd.bf16 %v738_v46, %v3143_v32 }
 0x130   : > { %v2630_v52 = vpop.f32.mrf.mxu0  ;;  %2708 = vmatmul.mubr.msk.bf16.gmra.mxu0 %vm883_vm0, %v831_v48 }
 0x131   : > { %v2806_v53 = vpop.eup %2805  ;;  %v707_v54 = vmul.bf16 %v3152_v49, %v3152_v49  ;;  %v770_v55 = vmul.bf16 1061961548, %v754_v51  ;;  %v622_v61 = vadd.f32 %v2629_v50, %v3086_v56 }
 0x132   : > { %v2631_v57 = vpop.f32.mrf.mxu0  ;;  %v800_v58 = vadd.bf16 1065369472, %v2806_v53 }
 0x133   : > { %v723_v60 = vmul.bf16 %v707_v54, %v3152_v49  ;;  %v2632_v40 = vadd.f32 %v2631_v57, %v2630_v52  ;;  %2809 = vtanh.bf16 %v770_v55 }
 0x134   : > { %v2633_v62 = vpop.f32.mrf.mxu0  ;;  %v816_v0 = vmul.bf16 1056980736, %v800_v58 }
 0x135   : > { %v739_v1 = vmul.bf16 1027030327, %v723_v60  ;;  %v625_v2 = vadd.f32 %v2632_v40, %v3086_v56 }
 0x136   : > { %v2634_v3 = vpop.f32.mrf.mxu0  ;;  %v832_v4 = vmul.bf16 %v816_v0, %v3123_v59 }
 0x137   : > { %v755_v5 = vadd.bf16 %v739_v1, %v3152_v49  ;;  %v3163_v63 = vpack.c.bf16 %v625_v2, %v622_v61  ;;  %v2635_v6 = vadd.f32 %v2634_v3, %v2633_v62 }
 0x138   : > { %v2636_v7 = vpop.f32.mrf.mxu0  ;;  %2711 = vmatprep.mubr.msk.bf16.mxu0 %vm883_vm0, %v832_v4 }
 0x139   : > { %v2808_v8 = vpop.eup %2807  ;;  %v771_v9 = vmul.bf16 1061961548, %v755_v5  ;;  %v708_v10 = vmul.bf16 %v3163_v63, %v3163_v63  ;;  %v630_v59 = vadd.f32 %v2635_v6, %v3086_v56 }
 0x13a   : > { %v2637_v11 = vpop.f32.mrf.mxu0  ;;  %v801_v13 = vadd.bf16 1065369472, %v2808_v8 }
 0x13b   : > { %2811 = vtanh.bf16 %v771_v9  ;;  %v724_v15 = vmul.bf16 %v708_v10, %v3163_v63  ;;  %v2638_v16 = vadd.f32 %v2637_v11, %v2636_v7 }
 0x13c   : > { %v817_v17 = vmul.bf16 1056980736, %v801_v13  ;;  %v2639_v18 = vpop.f32.mrf.mxu0 }
 0x13d   : > { %v740_v19 = vmul.bf16 1027030327, %v724_v15  ;;  %v633_v20 = vadd.f32 %v2638_v16, %v3086_v56 }
 0x13e   : > { %v833_v21 = vmul.bf16 %v817_v17, %v3133_v14  ;;  %v2640_v22 = vpop.f32.mrf.mxu0 }
 0x13f   : > { %v756_v12 = vadd.bf16 %v740_v19, %v3163_v63  ;;  %v3173_v23 = vpack.c.bf16 %v633_v20, %v630_v59  ;;  %v2641_v24 = vadd.f32 %v2640_v22, %v2639_v18 }
 0x140   : > { %2712 = vmatmul.mubr.msk.bf16.gmra.mxu0 %vm883_vm0, %v833_v21  ;;  %v2642_v25 = vpop.f32.mrf.mxu0 }
 0x141   : > { %v2810_v27 = vpop.eup %2809  ;;  %v772_v28 = vmul.bf16 1061961548, %v756_v12  ;;  %v709_v29 = vmul.bf16 %v3173_v23, %v3173_v23  ;;  %v638_v14 = vadd.f32 %v2641_v24, %v3086_v56 }
 0x142   : > { %v802_v30 = vadd.bf16 1065369472, %v2810_v27  ;;  %v2643_v31 = vpop.f32.mrf.mxu0 }
 0x143   : > { %2813 = vtanh.bf16 %v772_v28  ;;  %v725_v33 = vmul.bf16 %v709_v29, %v3173_v23  ;;  %v2644_v34 = vadd.f32 %v2643_v31, %v2642_v25 }
 0x144   : > { %v818_v35 = vmul.bf16 1056980736, %v802_v30  ;;  %v2645_v36 = vpop.f32.mrf.mxu0 }
 0x145   : > { %v741_v37 = vmul.bf16 1027030327, %v725_v33  ;;  %v641_v38 = vadd.f32 %v2644_v34, %v3086_v56 }
 0x146   : > { %v834_v39 = vmul.bf16 %v818_v35, %v3143_v32  ;;  %v2646_v41 = vpop.f32.mrf.mxu0 }
 0x147   : > { %v757_v42 = vadd.bf16 %v741_v37, %v3173_v23  ;;  %v3183_v26 = vpack.c.bf16 %v641_v38, %v638_v14  ;;  %v2647_v43 = vadd.f32 %v2646_v41, %v2645_v36 }
 0x148   : > { %2715 = vmatprep.mubr.msk.bf16.mxu1 %vm883_vm0, %v834_v39  ;;  %v2648_v44 = vpop.f32.mrf.mxu0 }
 0x149   : > { %v2812_v45 = vpop.eup %2811  ;;  %v773_v46 = vmul.bf16 1061961548, %v757_v42  ;;  %v710_v47 = vmul.bf16 %v3183_v26, %v3183_v26  ;;  %v646_v32 = vadd.f32 %v2647_v43, %v3086_v56 }
 0x14a   : > { %v803_v48 = vadd.bf16 1065369472, %v2812_v45  ;;  %v2649_v50 = vpop.f32.mrf.mxu0 }
 0x14b   : > { %2815 = vtanh.bf16 %v773_v46  ;;  %v726_v51 = vmul.bf16 %v710_v47, %v3183_v26  ;;  %v2650_v52 = vadd.f32 %v2649_v50, %v2648_v44 }
 0x14c   : > { %v819_v53 = vmul.bf16 1056980736, %v803_v48  ;;  %v2651_v54 = vpop.f32.mrf.mxu0 }
 0x14d   : > { %v742_v55 = vmul.bf16 1027030327, %v726_v51  ;;  %v649_v57 = vadd.f32 %v2650_v52, %v3086_v56 }
 0x14e   : > { %v835_v58 = vmul.bf16 %v819_v53, %v3152_v49  ;;  %v2652_v60 = vpop.f32.mrf.mxu0 }
 0x14f   : > { %v758_v61 = vadd.bf16 %v742_v55, %v3183_v26  ;;  %v3193_v40 = vpack.c.bf16 %v649_v57, %v646_v32  ;;  %v2653_v62 = vadd.f32 %v2652_v60, %v2651_v54 }
 0x150   : > { %2716 = vmatmul.mubr.msk.bf16.vlgmr.msra.gmra.mxu1 %vm883_vm0, %v835_v58  ;;  %v2654_v0 = vpop.f32.mrf.mxu0 }
 0x151   : > { %v2814_v1 = vpop.eup %2813  ;;  %v774_v2 = vmul.bf16 1061961548, %v758_v61  ;;  %v711_v3 = vmul.bf16 %v3193_v40, %v3193_v40  ;;  %v654_v49 = vadd.f32 %v2653_v62, %v3086_v56 }
 0x152   : > { %v804_v4 = vadd.bf16 1065369472, %v2814_v1  ;;  %v2655_v5 = vpop.f32.mrf.mxu0 }
 0x153   : > { %2817 = vtanh.bf16 %v774_v2  ;;  %v727_v6 = vmul.bf16 %v711_v3, %v3193_v40  ;;  %v2656_v7 = vadd.f32 %v2655_v5, %v2654_v0 }
 0x154   : > { %v820_v8 = vmul.bf16 1056980736, %v804_v4  ;;  %v2657_v9 = vpop.f32.mrf.mxu0 }
 0x155   : > { %v743_v10 = vmul.bf16 1027030327, %v727_v6  ;;  %v657_v11 = vadd.f32 %v2656_v7, %v3086_v56 }
 0x156   : > { %v836_v13 = vmul.bf16 %v820_v8, %v3163_v63  ;;  %v2658_v15 = vpop.f32.mrf.mxu0 }
 0x157   : > { %v759_v59 = vadd.bf16 %v743_v10, %v3193_v40  ;;  %v3203_v16 = vpack.c.bf16 %v657_v11, %v654_v49  ;;  %v2659_v17 = vadd.f32 %v2658_v15, %v2657_v9 }
 0x158   : > { %2719 = vmatprep.mubr.msk.bf16.mxu1 %vm883_vm0, %v836_v13  ;;  %v2660_v18 = vpop.f32.mrf.mxu0 }
 0x159   : > { %v2816_v19 = vpop.eup %2815  ;;  %v775_v20 = vmul.bf16 1061961548, %v759_v59  ;;  %v712_v21 = vmul.bf16 %v3203_v16, %v3203_v16  ;;  %v662_v63 = vadd.f32 %v2659_v17, %v3086_v56 }
 0x15a   : > { %v805_v22 = vadd.bf16 1065369472, %v2816_v19  ;;  %v2661_v12 = vpop.f32.mrf.mxu0 }
 0x15b   : > { %2819 = vtanh.bf16 %v775_v20  ;;  %v728_v24 = vmul.bf16 %v712_v21, %v3203_v16  ;;  %v2662_v25 = vadd.f32 %v2661_v12, %v2660_v18 }
 0x15c   : > { %v821_v27 = vmul.bf16 1056980736, %v805_v22  ;;  %v2663_v28 = vpop.f32.mrf.mxu0 }
 0x15d   : > { %v744_v29 = vmul.bf16 1027030327, %v728_v24  ;;  %v665_v30 = vadd.f32 %v2662_v25, %v3086_v56 }
 0x15e   : > { %v837_v31 = vmul.bf16 %v821_v27, %v3173_v23  ;;  %v2664_v33 = vpop.f32.mrf.mxu0  ;;  %v3230_v27 = vld [vmem:[%s4040_s4] ss:$0 sm:$0xff] }
 0x15f   : > { %v760_v14 = vadd.bf16 %v744_v29, %v3203_v16  ;;  %v697_v34 = vpack.c.bf16 %v665_v30, %v662_v63  ;;  %v2665_v35 = vadd.f32 %v2664_v33, %v2663_v28 }
 0x160   : > { %2720 = vmatmul.mubr.msk.bf16.gmra.mxu1 %vm883_vm0, %v837_v31  ;;  %v2666_v36 = vpop.f32.mrf.mxu0 }
 0x161   : > { %v2818_v37 = vpop.eup %2817  ;;  %v776_v38 = vmul.bf16 1061961548, %v760_v14  ;;  %v713_v39 = vmul.bf16 %v697_v34, %v697_v34  ;;  %v670_v44 = vadd.f32 %v2665_v35, %v3086_v56 }
 0x162   : > { %v2667_v41 = vpop.f32.mrf.mxu0  ;;  %v806_v42 = vadd.bf16 1065369472, %v2818_v37 }
 0x163   : > { %2821 = vtanh.bf16 %v776_v38  ;;  %v729_v43 = vmul.bf16 %v713_v39, %v697_v34  ;;  %v2668_v45 = vadd.f32 %v2667_v41, %v2666_v36 }
 0x164   : > { %v2669_v46 = vpop.f32.mrf.mxu0  ;;  %v822_v23 = vmul.bf16 1056980736, %v806_v42 }
 0x165   : > { %v745_v47 = vmul.bf16 1027030327, %v729_v43  ;;  %v673_v48 = vadd.f32 %v2668_v45, %v3086_v56 }
 0x166   : > { %v2670_v50 = vpop.f32.mrf.mxu0  ;;  %v838_v51 = vmul.bf16 %v822_v23, %v3183_v26 }
 0x167   : > { %v761_v32 = vadd.bf16 %v745_v47, %v697_v34  ;;  %v698_v52 = vpack.c.bf16 %v673_v48, %v670_v44  ;;  %v2671_v53 = vadd.f32 %v2670_v50, %v2669_v46 }
 0x168   : > { %v2672_v54 = vpop.f32.mrf.mxu0  ;;  %2723 = vmatprep.mubr.msk.bf16.mxu1 %vm883_vm0, %v838_v51 }
 0x169   : > { %v2820_v55 = vpop.eup %2819  ;;  %v777_v57 = vmul.bf16 1061961548, %v761_v32  ;;  %v714_v58 = vmul.bf16 %v698_v52, %v698_v52  ;;  %v678_v0 = vadd.f32 %v2671_v53, %v3086_v56 }
 0x16a   : > { %v2673_v60 = vpop.f32.mrf.mxu0  ;;  %v807_v61 = vadd.bf16 1065369472, %v2820_v55 }
 0x16b   : > { %2823 = vtanh.bf16 %v777_v57  ;;  %v730_v62 = vmul.bf16 %v714_v58, %v698_v52  ;;  %v2674_v1 = vadd.f32 %v2673_v60, %v2672_v54 }
 0x16c   : > { %v823_v2 = vmul.bf16 1056980736, %v807_v61 }
 0x16d   : > { %v746_v3 = vmul.bf16 1027030327, %v730_v62  ;;  %v681_v26 = vadd.f32 %v2674_v1, %v3086_v56 }
 0x16e   : > { %v839_v4 = vmul.bf16 %v823_v2, %v3193_v40 }
 0x16f   : > { %v762_v5 = vadd.bf16 %v746_v3, %v698_v52  ;;  %v699_v6 = vpack.c.bf16 %v681_v26, %v678_v0 }
 0x170   : > { %2724 = vmatmul.mubr.msk.bf16.gmra.mxu1 %vm883_vm0, %v839_v4 }
 0x171   : > { %v2822_v49 = vpop.eup %2821  ;;  %v778_v7 = vmul.bf16 1061961548, %v762_v5  ;;  %v715_v8 = vmul.bf16 %v699_v6, %v699_v6 }
 0x172   : > { %v808_v9 = vadd.bf16 1065369472, %v2822_v49 }
 0x173   : > { %2825 = vtanh.bf16 %v778_v7  ;;  %v731_v10 = vmul.bf16 %v715_v8, %v699_v6 }
 0x174   : > { %v824_v11 = vmul.bf16 1056980736, %v808_v9 }
 0x175   : > { %v747_v13 = vmul.bf16 1027030327, %v731_v10 }
 0x176   : > { %v840_v15 = vmul.bf16 %v824_v11, %v3203_v16 }
 0x177   : > { %v763_v59 = vadd.bf16 %v747_v13, %v699_v6 }
 0x178   : > { %2727 = vmatprep.mubr.msk.bf16.mxu1 %vm883_vm0, %v840_v15 }
 0x179   : > { %v2824_v56 = vpop.eup %2823  ;;  %v779_v17 = vmul.bf16 1061961548, %v763_v59 }
 0x17a   : > { %v809_v40 = vadd.bf16 1065369472, %v2824_v56 }
 0x17b   : > { %2827 = vtanh.bf16 %v779_v17 }
 0x17c   : > { %v825_v18 = vmul.bf16 1056980736, %v809_v40 }
 0x17e   : > { %v841_v19 = vmul.bf16 %v825_v18, %v697_v34 }
 0x180   : > { %2728 = vmatmul.mubr.msk.bf16.gmra.mxu1 %vm883_vm0, %v841_v19 }
 0x181   : > { %v2826_v20 = vpop.eup %2825 }
 0x182   : > { %v810_v21 = vadd.bf16 1065369472, %v2826_v20 }
 0x184   : > { %v826_v22 = vmul.bf16 1056980736, %v810_v21 }
 0x186   : > { %v842_v12 = vmul.bf16 %v826_v22, %v698_v52 }
 0x188   : > { %2731 = vmatprep.mubr.msk.bf16.mxu1 %vm883_vm0, %v842_v12 }
 0x189   : > { %v2828_v24 = vpop.eup %2827 }
 0x18a   : > { %v811_v63 = vadd.bf16 1065369472, %v2828_v24 }
 0x18c   : > { %v827_v16 = vmul.bf16 1056980736, %v811_v63 }
 0x18e   : > { %v843_v25 = vmul.bf16 %v827_v16, %v699_v6  ;;  %v4044_v6 = vlaneseq }
 0x190   : > { %2732 = vmatmul.mubr.msk.bf16.gmra.mxu1 %vm883_vm0, %v843_v25  ;;  %v3313_v8 = vand.u32 127, %v4044_v6 }
 0x1e0   : > { %v2705_v28 = vpop.f32.mrf.mxu0 }
 0x1e1   : > { %v3233_v29 = vadd.f32 %v2705_v28, %v3230_v27 }
 0x1e2   : > { %v966_v30 = vpop.f32.mrf.mxu0 }
 0x1e3   : > { %v3236_v31 = vadd.f32 %v3230_v27, %v966_v30  ;;  %1097 = vmax.xlane.f32.xlu1 %v3233_v29 }
 0x1e4   : > { %v2706_v33 = vpop.f32.mrf.mxu0 }
 0x1e5   : > { %v3240_v14 = vadd.f32 %v2706_v33, %v3230_v27  ;;  %1093 = vmax.xlane.f32.xlu0 %v3236_v31 }
 0x1e6   : > { %v969_v34 = vpop.f32.mrf.mxu0 }
 0x1e7   : > { %v3244_v35 = vadd.f32 %v3230_v27, %v969_v34  ;;  %1099 = vmax.xlane.f32.xlu1 %v3240_v14 }
 0x1e9   : > { %1095 = vmax.xlane.f32.xlu0 %v3244_v35 }
 0x1f0   : > { %v2709_v36 = vpop.f32.mrf.mxu0 }
 0x1f1   : > { %v3253_v42 = vadd.f32 %v2709_v36, %v3230_v27 }
 0x1f2   : > { %v982_v37 = vpop.f32.mrf.mxu0 }
 0x1f3   : > { %v3249_v38 = vadd.f32 %v3230_v27, %v982_v37 }
 0x1f4   : > { %v2710_v39 = vpop.f32.mrf.mxu0 }
 0x1f5   : > { %1101 = vmax.xlane.f32.xlu0 %v3249_v38  ;;  %v3261_v44 = vadd.f32 %v2710_v39, %v3230_v27 }
 0x1f6   : > { %v985_v41 = vpop.f32.mrf.mxu0 }
 0x1f7   : > { %v3256_v43 = vadd.f32 %v3230_v27, %v985_v41 }
 0x1f9   : > { %1103 = vmax.xlane.f32.xlu1 %v3256_v43  ;;  %1105 = vmax.xlane.f32.xlu0 %v3253_v42 }
 0x1fd   : > { %1107 = vmax.xlane.f32.xlu1 %v3261_v44 }
 0x200   : > { %v2713_v45 = vpop.f32.mrf.mxu0 }
 0x201   : > { %v3269_v50 = vadd.f32 %v2713_v45, %v3230_v27 }
 0x202   : > { %v998_v46 = vpop.f32.mrf.mxu0 }
 0x203   : > { %v3265_v23 = vadd.f32 %v3230_v27, %v998_v46 }
 0x204   : > { %v2714_v47 = vpop.f32.mrf.mxu0 }
 0x205   : > { %1109 = vmax.xlane.f32.xlu0 %v3265_v23  ;;  %v3277_v32 = vadd.f32 %v2714_v47, %v3230_v27 }
 0x206   : > { %v1001_v48 = vpop.f32.mrf.mxu0 }
 0x207   : > { %v3272_v51 = vadd.f32 %v3230_v27, %v1001_v48 }
 0x209   : > { %1111 = vmax.xlane.f32.xlu1 %v3272_v51  ;;  %1113 = vmax.xlane.f32.xlu0 %v3269_v50 }
 0x20d   : > { %1115 = vmax.xlane.f32.xlu1 %v3277_v32 }
 0x210   : > { %v2717_v52 = vpop.f32.mrf.mxu1 }
 0x211   : > { %v3285_v58 = vadd.f32 %v2717_v52, %v3230_v27 }
 0x212   : > { %v1014_v53 = vpop.f32.mrf.mxu1 }
 0x213   : > { %v3281_v54 = vadd.f32 %v3230_v27, %v1014_v53 }
 0x214   : > { %v2718_v55 = vpop.f32.mrf.mxu1 }
 0x215   : > { %1117 = vmax.xlane.f32.xlu0 %v3281_v54  ;;  %v3293_v61 = vadd.f32 %v2718_v55, %v3230_v27 }
 0x216   : > { %v1017_v57 = vpop.f32.mrf.mxu1 }
 0x217   : > { %v3288_v60 = vadd.f32 %v3230_v27, %v1017_v57 }
 0x219   : > { %1119 = vmax.xlane.f32.xlu1 %v3288_v60  ;;  %1121 = vmax.xlane.f32.xlu0 %v3285_v58 }
 0x21d   : > { %1123 = vmax.xlane.f32.xlu1 %v3293_v61 }
 0x220   : > { %v2721_v62 = vpop.f32.mrf.mxu1 }
 0x221   : > { %v3300_v3 = vadd.f32 %v2721_v62, %v3230_v27 }
 0x222   : > { %v1030_v0 = vpop.f32.mrf.mxu1 }
 0x223   : > { %v3297_v1 = vadd.f32 %v3230_v27, %v1030_v0 }
 0x224   : > { %v2722_v2 = vpop.f32.mrf.mxu1 }
 0x225   : > { %1125 = vmax.xlane.f32.xlu0 %v3297_v1  ;;  %v3307_v5 = vadd.f32 %v2722_v2, %v3230_v27 }
 0x226   : > { %v1033_v26 = vpop.f32.mrf.mxu1 }
 0x227   : > { %v3304_v4 = vadd.f32 %v3230_v27, %v1033_v26 }
 0x229   : > { %1127 = vmax.xlane.f32.xlu1 %v3304_v4  ;;  %1129 = vmax.xlane.f32.xlu0 %v3300_v3 }
 0x22d   : > { %1131 = vmax.xlane.f32.xlu1 %v3307_v5 }
 0x230   : > { %v2725_v49 = vpop.f32.mrf.mxu1 }
 0x231   : > { %v3353_v30 = vadd.f32 %v2725_v49, %v3230_v27 }
 0x232   : > { %v1046_v10 = vpop.f32.mrf.mxu1 }
 0x233   : > { %v3334_v20 = vadd.f32 %v3230_v27, %v1046_v10 }
 0x234   : > { %v2726_v17 = vpop.f32.mrf.mxu1 }
 0x235   : > { %v3365_v37 = vadd.f32 %v2726_v17, %v3230_v27 }
 0x236   : > { %v1049_v12 = vpop.f32.mrf.mxu1 }
 0x237   : > { %v3345_v63 = vadd.f32 %v3230_v27, %v1049_v12 }
 0x240   : > { %v2729_v28 = vpop.f32.mrf.mxu1 }
 0x241   : > { %v3401_v2 = vadd.f32 %v2729_v28, %v3230_v27 }
 0x242   : > { %v1062_v33 = vpop.f32.mrf.mxu1 }
 0x244   : > { %v2730_v39 = vpop.f32.mrf.mxu1 }
 0x246   : > { %v1065_v52 = vpop.f32.mrf.mxu1 }
 0x247   : > { %v3393_v55 = vadd.f32 %v3230_v27, %v1065_v52 }
 0x26c   : > { %v1098_v7 = vpop.xlane.xlu1 %1097 }
 0x26d   : > { %vm1161_vm2 = vcmp.eq.f32.partialorder %v3233_v29, %v1098_v7 }
 0x26e   : > { %v1094_v9 = vpop.xlane.xlu0 %1093  ;;  %v3325_v40 = vsel %vm1161_vm2, %v3313_v8, 128 }
 0x26f   : > { %vm1159_vm1 = vcmp.eq.f32.partialorder %v3236_v31, %v1094_v9  ;;  %v1252_v22 = vshra.s32 %v3325_v40, 16 }
 0x270   : > { %v3317_v11 = vsel %vm1159_vm1, %v3313_v8, 128  ;;  %v1100_v15 = vpop.xlane.xlu1 %1099 }
 0x271   : > { %v1224_v13 = vshra.s32 %v3317_v11, 16  ;;  %vm1162_vm4 = vcmp.eq.f32.partialorder %v3240_v14, %v1100_v15  ;;  %v3347_v16 = vcvt.s32.f32 %v1252_v22  ;;  %v3413_v15 = vadd.f32 %v2730_v39, %v3230_v27 }
 0x272   : > { %v1096_v59 = vpop.xlane.xlu0 %1095  ;;  %v3340_v24 = vsel %vm1162_vm4, %v3313_v8, 128 }
 0x273   : > { %vm1160_vm3 = vcmp.eq.f32.partialorder %v3244_v35, %v1096_v59  ;;  %v3322_v56 = vcvt.s32.f32 %v1224_v13  ;;  %v1266_v25 = vshra.s32 %v3340_v24, 16 }
 0x274   : > { %v3328_v18 = vsel %vm1160_vm3, %v3313_v8, 128 }
 0x275   : > { %1227 = vmin.xlane.f32.xlu0 %v3322_v56  ;;  %v1238_v19 = vshra.s32 %v3328_v18, 16  ;;  %v3356_v31 = vcvt.s32.f32 %v1266_v25 }
 0x277   : > { %v3336_v21 = vcvt.s32.f32 %v1238_v19 }
 0x279   : > { %1133 = vmax.xlane.f32.xlu0 %v3334_v20  ;;  %1241 = vmin.xlane.f32.xlu1 %v3336_v21 }
 0x27d   : > { %1255 = vmin.xlane.f32.xlu0 %v3347_v16  ;;  %1135 = vmax.xlane.f32.xlu1 %v3345_v63 }
 0x27e   : > { %v1102_v29 = vpop.xlane.xlu0 %1101 }
 0x27f   : > { %vm1163_vm5 = vcmp.eq.f32.partialorder %v3249_v38, %v1102_v29 }
 0x280   : > { %v3359_v14 = vsel %vm1163_vm5, %v3313_v8, 128 }
 0x281   : > { %1137 = vmax.xlane.f32.xlu0 %v3353_v30  ;;  %1269 = vmin.xlane.f32.xlu1 %v3356_v31  ;;  %v1280_v34 = vshra.s32 %v3359_v14, 16 }
 0x282   : > { %v1104_v35 = vpop.xlane.xlu1 %1103  ;;  %v1106_v36 = vpop.xlane.xlu0 %1105 }
 0x283   : > { %vm1164_vm6 = vcmp.eq.f32.partialorder %v3256_v43, %v1104_v35  ;;  %vm1165_vm7 = vcmp.eq.f32.partialorder %v3253_v42, %v1106_v36  ;;  %v3369_v38 = vcvt.s32.f32 %v1280_v34  ;;  %v3381_v43 = vadd.f32 %v3230_v27, %v1062_v33 }
 0x284   : > { %v3372_v41 = vsel %vm1164_vm6, %v3313_v8, 128  ;;  %v3375_v45 = vsel %vm1165_vm7, %v3313_v8, 128 }
 0x285   : > { %1139 = vmax.xlane.f32.xlu1 %v3365_v37  ;;  %1283 = vmin.xlane.f32.xlu0 %v3369_v38  ;;  %v1294_v46 = vshra.s32 %v3372_v41, 16  ;;  %v1308_v48 = vshra.s32 %v3375_v45, 16 }
 0x286   : > { %v1108_v47 = vpop.xlane.xlu1 %1107 }
 0x287   : > { %vm1166_vm8 = vcmp.eq.f32.partialorder %v3261_v44, %v1108_v47  ;;  %v3384_v42 = vcvt.s32.f32 %v1294_v46  ;;  %v3395_v57 = vcvt.s32.f32 %v1308_v48  ;;  %v2733_v44 = vpop.f32.mrf.mxu1 }
 0x288   : > { %v3388_v53 = vsel %vm1166_vm8, %v3313_v8, 128  ;;  %v3449_v36 = vadd.f32 %v2733_v44, %v3230_v27 }
 0x289   : > { %1297 = vmin.xlane.f32.xlu1 %v3384_v42  ;;  %1141 = vmax.xlane.f32.xlu0 %v3381_v43  ;;  %v1322_v62 = vshra.s32 %v3388_v53, 16  ;;  %v1078_v49 = vpop.f32.mrf.mxu1 }
 0x28b   : > { %v3404_v26 = vcvt.s32.f32 %v1322_v62  ;;  %v2734_v59 = vpop.f32.mrf.mxu1 }
 0x28c   : > { %v3461_v62 = vadd.f32 %v2734_v59, %v3230_v27 }
 0x28d   : > { %1143 = vmax.xlane.f32.xlu1 %v3393_v55  ;;  %1311 = vmin.xlane.f32.xlu0 %v3395_v57  ;;  %v1081_v28 = vpop.f32.mrf.mxu1 }
 0x28e   : > { %v1110_v0 = vpop.xlane.xlu0 %1109  ;;  %v3441_v33 = vadd.f32 %v3230_v27, %v1081_v28 }
 0x28f   : > { %vm1167_vm9 = vcmp.eq.f32.partialorder %v3265_v23, %v1110_v0 }
 0x290   : > { %v3407_v7 = vsel %vm1167_vm9, %v3313_v8, 128 }
 0x291   : > { %1325 = vmin.xlane.f32.xlu1 %v3404_v26  ;;  %1145 = vmax.xlane.f32.xlu0 %v3401_v2  ;;  %v1336_v9 = vshra.s32 %v3407_v7, 16 }
 0x292   : > { %v1112_v10 = vpop.xlane.xlu1 %1111  ;;  %v1114_v13 = vpop.xlane.xlu0 %1113 }
 0x293   : > { %vm1168_vm10 = vcmp.eq.f32.partialorder %v3272_v51, %v1112_v10  ;;  %vm1169_vm11 = vcmp.eq.f32.partialorder %v3269_v50, %v1114_v13  ;;  %v3417_v23 = vcvt.s32.f32 %v1336_v9  ;;  %v3429_v51 = vadd.f32 %v3230_v27, %v1078_v49 }
 0x294   : > { %v3420_v17 = vsel %vm1168_vm10, %v3313_v8, 128  ;;  %v3423_v19 = vsel %vm1169_vm11, %v3313_v8, 128 }
 0x295   : > { %1147 = vmax.xlane.f32.xlu1 %v3413_v15  ;;  %1339 = vmin.xlane.f32.xlu0 %v3417_v23  ;;  %v1350_v22 = vshra.s32 %v3420_v17, 16  ;;  %v1364_v25 = vshra.s32 %v3423_v19, 16 }
 0x296   : > { %v1116_v12 = vpop.xlane.xlu1 %1115 }
 0x297   : > { %vm1170_vm12 = vcmp.eq.f32.partialorder %v3277_v32, %v1116_v12  ;;  %v3432_v50 = vcvt.s32.f32 %v1350_v22  ;;  %v3443_v34 = vcvt.s32.f32 %v1364_v25 }
 0x298   : > { %v3436_v29 = vsel %vm1170_vm12, %v3313_v8, 128 }
 0x299   : > { %1353 = vmin.xlane.f32.xlu1 %v3432_v50  ;;  %1149 = vmax.xlane.f32.xlu0 %v3429_v51  ;;  %v1378_v35 = vshra.s32 %v3436_v29, 16 }
 0x29b   : > { %v3452_v39 = vcvt.s32.f32 %v1378_v35 }
 0x29d   : > { %1151 = vmax.xlane.f32.xlu1 %v3441_v33  ;;  %1367 = vmin.xlane.f32.xlu0 %v3443_v34 }
 0x29e   : > { %v1118_v32 = vpop.xlane.xlu0 %1117 }
 0x29f   : > { %vm1171_vm13 = vcmp.eq.f32.partialorder %v3281_v54, %v1118_v32 }
 0x2a0   : > { %v3455_v46 = vsel %vm1171_vm13, %v3313_v8, 128 }
 0x2a1   : > { %1381 = vmin.xlane.f32.xlu1 %v3452_v39  ;;  %1153 = vmax.xlane.f32.xlu0 %v3449_v36  ;;  %v1392_v47 = vshra.s32 %v3455_v46, 16 }
 0x2a2   : > { %v1120_v48 = vpop.xlane.xlu1 %1119  ;;  %v1122_v52 = vpop.xlane.xlu0 %1121 }
 0x2a3   : > { %vm1172_vm14 = vcmp.eq.f32.partialorder %v3288_v60, %v1120_v48  ;;  %vm1173_vm15 = vcmp.eq.f32.partialorder %v3285_v58, %v1122_v52  ;;  %v3465_v54 = vcvt.s32.f32 %v1392_v47 }
 0x2a4   : > { %v3468_v44 = vsel %vm1172_vm14, %v3313_v8, 128  ;;  %v3471_v0 = vsel %vm1173_vm15, %v3313_v8, 128 }
 0x2a5   : > { %1155 = vmax.xlane.f32.xlu1 %v3461_v62  ;;  %1395 = vmin.xlane.f32.xlu0 %v3465_v54  ;;  %v1406_v49 = vshra.s32 %v3468_v44, 16  ;;  %v1420_v27 = vshra.s32 %v3471_v0, 16 }
 0x2a6   : > { %v1124_v9 = vpop.xlane.xlu1 %1123 }
 0x2a7   : > { %vm1174_vm0 = vcmp.eq.f32.partialorder %v3293_v61, %v1124_v9  ;;  %v3478_v58 = vcvt.s32.f32 %v1406_v49  ;;  %v3480_v60 = vcvt.s32.f32 %v1420_v27 }
 0x2a8   : > { %v3483_v10 = vsel %vm1174_vm0, %v3313_v8, 128 }
 0x2a9   : > { %1409 = vmin.xlane.f32.xlu1 %v3478_v58  ;;  %1423 = vmin.xlane.f32.xlu0 %v3480_v60  ;;  %v1434_v13 = vshra.s32 %v3483_v10, 16 }
 0x2ab   : > { %v3488_v59 = vcvt.s32.f32 %v1434_v13  ;;  %v2775_v13 = vld [vmem:[%s4041_s5 + $0x74] ss:$8 sps:$4 sm:$0xff]  }
 0x2ac   : > { %1891 = vmatprep.subr.bf16.mxu1 %v2775_v13  ;;  %v2788_v13 = vld [vmem:[%s4041_s5 + $0x20] ss:$8 sps:$4 sm:$0xff]  }
 0x2ad   : > { %1437 = vmin.xlane.f32.xlu1 %v3488_v59 }
 0x2ae   : > { %v1126_v22 = vpop.xlane.xlu0 %1125 }
 0x2af   : > { %vm1175_vm1 = vcmp.eq.f32.partialorder %v3297_v1, %v1126_v22  ;;  %v2778_v22 = vld [vmem:[%s4041_s5 + $0x64] ss:$8 sps:$4 sm:$0xff]  }
 0x2b0   : > { %v3493_v61 = vsel %vm1175_vm1, %v3313_v8, 128 }
 0x2b1   : > { %v1448_v12 = vshra.s32 %v3493_v61, 16 }
 0x2b2   : > { %v1128_v25 = vpop.xlane.xlu1 %1127  ;;  %v1130_v28 = vpop.xlane.xlu0 %1129 }
 0x2b3   : > { %vm1176_vm2 = vcmp.eq.f32.partialorder %v3304_v4, %v1128_v25  ;;  %vm1177_vm3 = vcmp.eq.f32.partialorder %v3300_v3, %v1130_v28  ;;  %v3498_v35 = vcvt.s32.f32 %v1448_v12  ;;  %v2776_v12 = vld [vmem:[%s4041_s5 + $0x60] ss:$8 sps:$4 sm:$0xff]   ;;  %v2781_v25 = vld [vmem:[%s4041_s5 + $0x54] ss:$8 sps:$4 sm:$0xff]   ;;  %v2779_v28 = vld [vmem:[%s4041_s5 + $0x50] ss:$8 sps:$4 sm:$0xff]  }
 0x2b4   : > { %v3501_v32 = vsel %vm1176_vm2, %v3313_v8, 128  ;;  %v3504_v47 = vsel %vm1177_vm3, %v3313_v8, 128 }
 0x2b5   : > { %1451 = vmin.xlane.f32.xlu0 %v3498_v35  ;;  %v1462_v1 = vshra.s32 %v3501_v32, 16  ;;  %v1476_v48 = vshra.s32 %v3504_v47, 16 }
 0x2b6   : > { %v1132_v52 = vpop.xlane.xlu1 %1131 }
 0x2b7   : > { %vm1178_vm4 = vcmp.eq.f32.partialorder %v3307_v5, %v1132_v52  ;;  %v3510_v4 = vcvt.s32.f32 %v1462_v1  ;;  %v3512_v3 = vcvt.s32.f32 %v1476_v48  ;;  %v2773_v5 = vld [vmem:[%s4041_s5 + $0x70] ss:$8 sps:$4 sm:$0xff]   ;;  %v2784_v1 = vld [vmem:[%s4041_s5 + $0x44] ss:$8 sps:$4 sm:$0xff]   ;;  %v2782_v48 = vld [vmem:[%s4041_s5 + $0x40] ss:$8 sps:$4 sm:$0xff]  }
 0x2b8   : > { %v3515_v49 = vsel %vm1178_vm4, %v3313_v8, 128  ;;  %1892 = vmatpush1.bf16.msra.mxu1 %v2773_v5  ;;  %v2787_v52 = vld [vmem:[%s4041_s5 + $0x34] ss:$8 sps:$4 sm:$0xff]   ;;  %v2790_v5 = vld [vmem:[%s4041_s5 + $0x24] ss:$8 sps:$4 sm:$0xff]  }
 0x2b9   : > { %1465 = vmin.xlane.f32.xlu1 %v3510_v4  ;;  %1479 = vmin.xlane.f32.xlu0 %v3512_v3  ;;  %v1490_v27 = vshra.s32 %v3515_v49, 16 }
 0x2ba   : > { %1893 = vmatprep.subr.bf16.mxu1 %v2778_v22  ;;  %v1223_v22 = vand.u32 65535, %v3317_v11 }
 0x2bb   : > { %v3520_v9 = vcvt.s32.f32 %v1490_v27  ;;  %v2785_v27 = vld [vmem:[%s4041_s5 + $0x30] ss:$8 sps:$4 sm:$0xff]  }
 0x2bc   : > { %1894 = vmatpush1.bf16.msra.mxu1 %v2776_v12  ;;  %v1237_v12 = vand.u32 65535, %v3328_v18 }
 0x2bd   : > { %1493 = vmin.xlane.f32.xlu1 %v3520_v9  ;;  %1895 = vmatprep.subr.bf16.mxu1 %v2781_v25 }
 0x2be   : > { %v1239_v6 = vcvt.s32.f32 %v1237_v12 }
 0x2c0   : > { %1896 = vmatpush1.bf16.msra.mxu1 %v2779_v28  ;;  %v1225_v28 = vcvt.s32.f32 %v1223_v22 }
 0x2c1   : > { %1897 = vmatprep.subr.bf16.mxu1 %v2784_v1 }
 0x2c4   : > { %1898 = vmatpush1.bf16.msra.mxu1 %v2782_v48  ;;  %v1251_v48 = vand.u32 65535, %v3325_v40 }
 0x2c5   : > { %1899 = vmatprep.subr.bf16.mxu1 %v2787_v52 }
 0x2c6   : > { %v1253_v40 = vcvt.s32.f32 %v1251_v48  ;;  %v2793_v48 = vld [vmem:[%s4041_s5 + $0x14] ss:$8 sps:$4 sm:$0xff]  }
 0x2c8   : > { %1900 = vmatpush1.bf16.msra.mxu1 %v2785_v27 }
 0x2c9   : > { %1901 = vmatprep.subr.bf16.mxu1 %v2790_v5 }
 0x2cc   : > { %1902 = vmatpush1.bf16.msra.mxu1 %v2788_v13 }
 0x2cd   : > { %1903 = vmatprep.subr.bf16.mxu1 %v2793_v48 }
 0x2fe   : > { %v3561_v25 = vpop.xlane.xlu0 %1227 }
 0x2ff   : > { %vm1229_vm5 = vcmp.eq.f32.partialorder %v3322_v56, %v3561_v25  ;;  %v1265_v56 = vand.u32 65535, %v3340_v24 }
 0x300   : > { %v1230_v1 = vsel %vm1229_vm5, %v1225_v28, inf }
 0x301   : > { %1231 = vmin.xlane.f32.xlu0 %v1230_v1  ;;  %v1267_v24 = vcvt.s32.f32 %v1265_v56 }
 0x302   : > { %v3566_v52 = vpop.xlane.xlu1 %1241  ;;  %v1134_v27 = vpop.xlane.xlu0 %1133 }
 0x303   : > { %vm1179_vm6 = vcmp.eq.f32.partialorder %v3334_v20, %v1134_v27  ;;  %vm1243_vm7 = vcmp.eq.f32.partialorder %v3336_v21, %v3566_v52  ;;  %v1279_v27 = vand.u32 65535, %v3359_v14 }
 0x304   : > { %v3572_v11 = vsel %vm1179_vm6, %v3313_v8, 128  ;;  %v1244_v18 = vsel %vm1243_vm7, %v1239_v6, inf }
 0x305   : > { %1245 = vmin.xlane.f32.xlu1 %v1244_v18  ;;  %v1504_v20 = vshra.s32 %v3572_v11, 16  ;;  %v1281_v48 = vcvt.s32.f32 %v1279_v27 }
 0x306   : > { %v1136_v5 = vpop.xlane.xlu1 %1135  ;;  %v3575_v13 = vpop.xlane.xlu0 %1255 }
 0x307   : > { %vm1180_vm8 = vcmp.eq.f32.partialorder %v3345_v63, %v1136_v5  ;;  %vm1257_vm9 = vcmp.eq.f32.partialorder %v3347_v16, %v3575_v13  ;;  %v3589_v63 = vcvt.s32.f32 %v1504_v20 }
 0x308   : > { %v3582_v21 = vsel %vm1180_vm8, %v3313_v8, 128  ;;  %v1258_v22 = vsel %vm1257_vm9, %v1253_v40, inf }
 0x309   : > { %1259 = vmin.xlane.f32.xlu0 %v1258_v22  ;;  %v1518_v16 = vshra.s32 %v3582_v21, 16  ;;  %v2796_v22 = vld [vmem:[%s4041_s5 + $0x4] ss:$8 sps:$4 sm:$0xff]  }
 0x30a   : > { %v3584_v6 = vpop.xlane.xlu1 %1269  ;;  %v1138_v12 = vpop.xlane.xlu0 %1137 }
 0x30b   : > { %vm1181_vm10 = vcmp.eq.f32.partialorder %v3353_v30, %v1138_v12  ;;  %vm1271_vm11 = vcmp.eq.f32.partialorder %v3356_v31, %v3584_v6  ;;  %v2791_v31 = vld [vmem:[%s4041_s5 + $0x10] ss:$8 sps:$4 sm:$0xff]   ;;  %v3607_v5 = vcvt.s32.f32 %v1518_v16  ;;  %v1293_v12 = vand.u32 65535, %v3372_v41 }
 0x30c   : > { %v3593_v28 = vsel %vm1181_vm10, %v3313_v8, 128  ;;  %v1272_v1 = vsel %vm1271_vm11, %v1267_v24, inf  ;;  %1904 = vmatpush1.bf16.msra.mxu1 %v2791_v31  ;;  %v1307_v24 = vand.u32 65535, %v3375_v45  ;;  %v1321_v41 = vand.u32 65535, %v3388_v53 }
 0x30d   : > { %1273 = vmin.xlane.f32.xlu1 %v1272_v1  ;;  %1507 = vmin.xlane.f32.xlu0 %v3589_v63  ;;  %v1532_v30 = vshra.s32 %v3593_v28, 16 }
 0x30e   : > { %v1140_v18 = vpop.xlane.xlu1 %1139  ;;  %v3604_v56 = vpop.xlane.xlu0 %1283  ;;  %1905 = vmatprep.subr.bf16.mxu1 %v2796_v22  ;;  %v2901_v22 = vmov 0  }
 0x30f   : > { %vm1182_vm12 = vcmp.eq.f32.partialorder %v3365_v37, %v1140_v18  ;;  %v3609_v40 = vcvt.s32.f32 %v1532_v30  ;;  %vm1285_vm13 = vcmp.eq.f32.partialorder %v3369_v38, %v3604_v56  ;;  %v2794_v37 = vld [vmem:[%s4041_s5] ss:$8 sps:$4 sm:$0xff]   ;;  %v1295_v18 = vcvt.s32.f32 %v1293_v12  ;;  %1923 = vmatprep.mubr.bf16.mxu1 %v2901_v22 }
 0x310   : > { %v3612_v20 = vsel %vm1182_vm12, %v3313_v8, 128  ;;  %1906 = vmatpush1.bf16.msra.mxu1 %v2794_v37  ;;  %v1286_v31 = vsel %vm1285_vm13, %v1281_v48, inf }
 0x311   : > { %1521 = vmin.xlane.f32.xlu1 %v3607_v5  ;;  %1535 = vmin.xlane.f32.xlu0 %v3609_v40  ;;  %v1546_v14 = vshra.s32 %v3612_v20, 16 }
 0x312   : > { %v3627_v16 = vpop.xlane.xlu1 %1297  ;;  %v1142_v1 = vpop.xlane.xlu0 %1141 }
 0x313   : > { %vm1183_vm14 = vcmp.eq.f32.partialorder %v3381_v43, %v1142_v1  ;;  %v3630_v30 = vcvt.s32.f32 %v1546_v14  ;;  %vm1299_vm15 = vcmp.eq.f32.partialorder %v3384_v42, %v3627_v16  ;;  %v1309_v43 = vcvt.s32.f32 %v1307_v24 }
 0x314   : > { %v3633_v38 = vsel %vm1183_vm14, %v3313_v8, 128  ;;  %v1300_v42 = vsel %vm1299_vm15, %v1295_v18, inf  ;;  %v1323_v24 = vcvt.s32.f32 %v1321_v41  ;;  %v1335_v41 = vand.u32 65535, %v3407_v7 }
 0x315   : > { %1549 = vmin.xlane.f32.xlu1 %v3630_v30  ;;  %1287 = vmin.xlane.f32.xlu0 %v1286_v31  ;;  %v1560_v14 = vshra.s32 %v3633_v38, 16  ;;  %v1349_v7 = vand.u32 65535, %v3420_v17 }
 0x316   : > { %v1144_v45 = vpop.xlane.xlu1 %1143  ;;  %v3639_v27 = vpop.xlane.xlu0 %1311 }
 0x317   : > { %vm1184_vm0 = vcmp.eq.f32.partialorder %v3393_v55, %v1144_v45  ;;  %vm1313_vm1 = vcmp.eq.f32.partialorder %v3395_v57, %v3639_v27  ;;  %v3654_v55 = vcvt.s32.f32 %v1560_v14 }
 0x318   : > { %v3647_v37 = vsel %vm1184_vm0, %v3313_v8, 128  ;;  %v1314_v53 = vsel %vm1313_vm1, %v1309_v43, inf }
 0x319   : > { %1301 = vmin.xlane.f32.xlu1 %v1300_v42  ;;  %1315 = vmin.xlane.f32.xlu0 %v1314_v53  ;;  %v1574_v57 = vshra.s32 %v3647_v37, 16 }
 0x31a   : > { %v3649_v1 = vpop.xlane.xlu1 %1325  ;;  %v1146_v12 = vpop.xlane.xlu0 %1145 }
 0x31b   : > { %vm1185_vm2 = vcmp.eq.f32.partialorder %v3401_v2, %v1146_v12  ;;  %vm1327_vm3 = vcmp.eq.f32.partialorder %v3404_v26, %v3649_v1  ;;  %v3666_v26 = vcvt.s32.f32 %v1574_v57 }
 0x31c   : > { %v3658_v48 = vsel %vm1185_vm2, %v3313_v8, 128  ;;  %v1328_v31 = vsel %vm1327_vm3, %v1323_v24, inf  ;;  %v1337_v24 = vcvt.s32.f32 %v1335_v41  ;;  %v1351_v41 = vcvt.s32.f32 %v1349_v7 }
 0x31d   : > { %1329 = vmin.xlane.f32.xlu1 %v1328_v31  ;;  %1563 = vmin.xlane.f32.xlu0 %v3654_v55  ;;  %v1588_v45 = vshra.s32 %v3658_v48, 16 }
 0x31e   : > { %v1148_v18 = vpop.xlane.xlu1 %1147  ;;  %v3663_v2 = vpop.xlane.xlu0 %1339 }
 0x31f   : > { %vm1186_vm4 = vcmp.eq.f32.partialorder %v3413_v15, %v1148_v18  ;;  %v3668_v43 = vcvt.s32.f32 %v1588_v45  ;;  %vm1341_vm5 = vcmp.eq.f32.partialorder %v3417_v23, %v3663_v2  ;;  %v1363_v15 = vand.u32 65535, %v3423_v19 }
 0x320   : > { %v3671_v14 = vsel %vm1186_vm4, %v3313_v8, 128  ;;  %v1342_v45 = vsel %vm1341_vm5, %v1337_v24, inf  ;;  %v1377_v23 = vand.u32 65535, %v3436_v29 }
 0x321   : > { %1577 = vmin.xlane.f32.xlu1 %v3666_v26  ;;  %1591 = vmin.xlane.f32.xlu0 %v3668_v43  ;;  %v1602_v42 = vshra.s32 %v3671_v14, 16  ;;  %v1365_v18 = vcvt.s32.f32 %v1363_v15 }
 0x322   : > { %v3680_v53 = vpop.xlane.xlu1 %1353  ;;  %v1150_v12 = vpop.xlane.xlu0 %1149  ;;  %v1379_v15 = vcvt.s32.f32 %v1377_v23 }
 0x323   : > { %vm1187_vm6 = vcmp.eq.f32.partialorder %v3429_v51, %v1150_v12  ;;  %v3683_v57 = vcvt.s32.f32 %v1602_v42  ;;  %vm1355_vm7 = vcmp.eq.f32.partialorder %v3432_v50, %v3680_v53  ;;  %v1391_v50 = vand.u32 65535, %v3455_v46 }
 0x324   : > { %v3686_v31 = vsel %vm1187_vm6, %v3313_v8, 128  ;;  %v1356_v12 = vsel %vm1355_vm7, %v1351_v41, inf  ;;  %v1405_v46 = vand.u32 65535, %v3468_v44  ;;  %v1419_v44 = vand.u32 65535, %v3471_v0 }
 0x325   : > { %1605 = vmin.xlane.f32.xlu1 %v3683_v57  ;;  %1343 = vmin.xlane.f32.xlu0 %v1342_v45  ;;  %v1616_v51 = vshra.s32 %v3686_v31, 16  ;;  %v1433_v0 = vand.u32 65535, %v3483_v10  ;;  %v1475_v10 = vand.u32 65535, %v3504_v47 }
 0x326   : > { %v1152_v17 = vpop.xlane.xlu1 %1151  ;;  %v3692_v19 = vpop.xlane.xlu0 %1367 }
 0x327   : > { %vm1188_vm8 = vcmp.eq.f32.partialorder %v3441_v33, %v1152_v17  ;;  %vm1369_vm9 = vcmp.eq.f32.partialorder %v3443_v34, %v3692_v19  ;;  %v3707_v33 = vcvt.s32.f32 %v1616_v51 }
 0x328   : > { %v3699_v42 = vsel %vm1188_vm8, %v3313_v8, 128  ;;  %v1370_v24 = vsel %vm1369_vm9, %v1365_v18, inf }
 0x329   : > { %1357 = vmin.xlane.f32.xlu1 %v1356_v12  ;;  %1371 = vmin.xlane.f32.xlu0 %v1370_v24  ;;  %v1630_v34 = vshra.s32 %v3699_v42, 16 }
 0x32a   : > { %v3702_v29 = vpop.xlane.xlu1 %1381  ;;  %v1154_v7 = vpop.xlane.xlu0 %1153 }
 0x32b   : > { %vm1189_vm10 = vcmp.eq.f32.partialorder %v3449_v36, %v1154_v7  ;;  %vm1383_vm11 = vcmp.eq.f32.partialorder %v3452_v39, %v3702_v29  ;;  %v1393_v36 = vcvt.s32.f32 %v1391_v50  ;;  %v3718_v39 = vcvt.s32.f32 %v1630_v34 }
 0x32c   : > { %v3711_v45 = vsel %vm1189_vm10, %v3313_v8, 128  ;;  %v1384_v17 = vsel %vm1383_vm11, %v1379_v15, inf }
 0x32d   : > { %1385 = vmin.xlane.f32.xlu1 %v1384_v17  ;;  %1619 = vmin.xlane.f32.xlu0 %v3707_v33  ;;  %v1644_v18 = vshra.s32 %v3711_v45, 16  ;;  %v1421_v17 = vcvt.s32.f32 %v1419_v44 }
 0x32e   : > { %v1156_v41 = vpop.xlane.xlu1 %1155  ;;  %v3715_v23 = vpop.xlane.xlu0 %1395 }
 0x32f   : > { %vm1190_vm12 = vcmp.eq.f32.partialorder %v3461_v62, %v1156_v41  ;;  %vm1397_vm13 = vcmp.eq.f32.partialorder %v3465_v54, %v3715_v23  ;;  %v1407_v62 = vcvt.s32.f32 %v1405_v46  ;;  %v3734_v54 = vcvt.s32.f32 %v1644_v18 }
 0x330   : > { %v3724_v51 = vsel %vm1190_vm12, %v3313_v8, 128  ;;  %v1398_v12 = vsel %vm1397_vm13, %v1393_v36, inf  ;;  %v1435_v36 = vcvt.s32.f32 %v1433_v0  ;;  %v1477_v0 = vcvt.s32.f32 %v1475_v10 }
 0x331   : > { %1633 = vmin.xlane.f32.xlu1 %v3718_v39  ;;  %1399 = vmin.xlane.f32.xlu0 %v1398_v12  ;;  %v1658_v7 = vshra.s32 %v3724_v51, 16 }
 0x332   : > { %v3728_v24 = vpop.xlane.xlu1 %1409  ;;  %v3730_v50 = vpop.xlane.xlu0 %1423 }
 0x333   : > { %vm1411_vm14 = vcmp.eq.f32.partialorder %v3478_v58, %v3728_v24  ;;  %vm1425_vm15 = vcmp.eq.f32.partialorder %v3480_v60, %v3730_v50  ;;  %v3743_v46 = vcvt.s32.f32 %v1658_v7  ;;  %v1447_v58 = vand.u32 65535, %v3493_v61 }
 0x334   : > { %v1412_v15 = vsel %vm1411_vm14, %v1407_v62, inf  ;;  %v1426_v41 = vsel %vm1425_vm15, %v1421_v17, inf  ;;  %v1461_v60 = vand.u32 65535, %v3501_v32  ;;  %v1489_v7 = vand.u32 65535, %v3515_v49 }
 0x335   : > { %1413 = vmin.xlane.f32.xlu1 %v1412_v15  ;;  %1647 = vmin.xlane.f32.xlu0 %v3734_v54  ;;  %v1449_v44 = vcvt.s32.f32 %v1447_v58 }
 0x336   : > { %v3741_v34 = vpop.xlane.xlu1 %1437  ;;  %v1463_v15 = vcvt.s32.f32 %v1461_v60  ;;  %v1491_v17 = vcvt.s32.f32 %v1489_v7  ;;  %v1503_v7 = vand.u32 65535, %v3572_v11 }
 0x337   : > { %vm1439_vm0 = vcmp.eq.f32.partialorder %v3488_v59, %v3741_v34 }
 0x338   : > { %v1440_v18 = vsel %vm1439_vm0, %v1435_v36, inf  ;;  %v1505_v11 = vcvt.s32.f32 %v1503_v7 }
 0x339   : > { %1661 = vmin.xlane.f32.xlu1 %v3743_v46  ;;  %1427 = vmin.xlane.f32.xlu0 %v1426_v41  ;;  %v1234_v41 = vcvt.f32.s32 %v3561_v25 }
 0x33d   : > { %1441 = vmin.xlane.f32.xlu1 %v1440_v18  ;;  %v1235_v18 = vshll.u32 %v1234_v41, 16 }
 0x33e   : > { %v3751_v12 = vpop.xlane.xlu0 %1451 }
 0x33f   : > { %vm1453_vm1 = vcmp.eq.f32.partialorder %v3498_v35, %v3751_v12 }
 0x340   : > { %v1454_v62 = vsel %vm1453_vm1, %v1449_v44, inf }
 0x341   : > { %1455 = vmin.xlane.f32.xlu0 %v1454_v62  ;;  %v1262_v62 = vcvt.f32.s32 %v3575_v13 }
 0x342   : > { %v3756_v59 = vpop.xlane.xlu1 %1465  ;;  %v3758_v61 = vpop.xlane.xlu0 %1479 }
 0x343   : > { %vm1467_vm2 = vcmp.eq.f32.partialorder %v3510_v4, %v3756_v59  ;;  %vm1481_vm3 = vcmp.eq.f32.partialorder %v3512_v3, %v3758_v61  ;;  %v1248_v4 = vcvt.f32.s32 %v3566_v52  ;;  %v1263_v52 = vshll.u32 %v1262_v62, 16 }
 0x344   : > { %v1468_v32 = vsel %vm1467_vm2, %v1463_v15, inf  ;;  %v1482_v47 = vsel %vm1481_vm3, %v1477_v0, inf }
 0x345   : > { %1469 = vmin.xlane.f32.xlu1 %v1468_v32  ;;  %1483 = vmin.xlane.f32.xlu0 %v1482_v47  ;;  %v1249_v60 = vshll.u32 %v1248_v4, 16  ;;  %v2902_v32 = vmov 1.0|1.0   ;;  %v1517_v47 = vand.u32 65535, %v3582_v21 }
 0x346   : > { %v3764_v35 = vpop.xlane.xlu1 %1493 }
 0x347   : > { %vm1495_vm4 = vcmp.eq.f32.partialorder %v3520_v9, %v3764_v35  ;;  %v1276_v9 = vcvt.f32.s32 %v3584_v6  ;;  %v1531_v6 = vand.u32 65535, %v3593_v28 }
 0x348   : > { %v1496_v49 = vsel %vm1495_vm4, %v1491_v17, inf }
 0x349   : > { %1497 = vmin.xlane.f32.xlu1 %v1496_v49  ;;  %v1277_v17 = vshll.u32 %v1276_v9, 16  ;;  %v1533_v28 = vcvt.s32.f32 %v1531_v6 }
 0x38a   : > { %v1232_v58 = vpop.xlane.xlu0 %1231 }
 0x38b   : > { %v1233_v36 = vcvt.f32.s32 %v1232_v58 }
 0x38d   : > { %v1236_v10 = vadd.s32 %v1235_v18, %v1233_v36  ;;  %v1545_v18 = vand.u32 65535, %v3612_v20 }
 0x38e   : > { %v1246_v3 = vpop.xlane.xlu1 %1245 }
 0x38f   : > { %v1247_v44 = vcvt.f32.s32 %v1246_v3  ;;  %vm1671_vm5 = vcmp.eq.s32.totalorder %v3313_v8, %v1236_v10  ;;  %v1547_v62 = vcvt.s32.f32 %v1545_v18 }
 0x391   : > { %v1250_v15 = vadd.s32 %v1249_v60, %v1247_v44  ;;  %v1519_v60 = vcvt.s32.f32 %v1517_v47 }
 0x392   : > { %v1260_v0 = vpop.xlane.xlu0 %1259 }
 0x393   : > { %vm1672_vm6 = vcmp.eq.s32.totalorder %v3313_v8, %v1250_v15  ;;  %v1261_v25 = vcvt.f32.s32 %v1260_v0  ;;  %v1304_v15 = vcvt.f32.s32 %v3627_v16  ;;  %v1318_v0 = vcvt.f32.s32 %v3639_v27 }
 0x394   : > { %vm2495_vm7 = vmpackc.low %vm1672_vm6, %vm1671_vm5 }
 0x395   : > { %2496 = vmatmul.mubr.msk.bf16.vlgmr.msra.gmra.mxu1 %vm2495_vm7, %v2902_v32  ;;  %v1264_v41 = vadd.s32 %v1263_v52, %v1261_v25  ;;  %v1332_v25 = vcvt.f32.s32 %v3649_v1 }
 0x396   : > { %v1274_v13 = vpop.xlane.xlu1 %1273  ;;  %v3777_v49 = vpop.xlane.xlu0 %1507  ;;  %1933 = vmatprep.mubr.bf16.mxu1 %v2901_v22 }
 0x397   : > { %v1275_v58 = vcvt.f32.s32 %v1274_v13  ;;  %vm1509_vm8 = vcmp.eq.f32.partialorder %v3589_v63, %v3777_v49  ;;  %vm1673_vm10 = vcmp.eq.s32.totalorder %v3313_v8, %v1264_v41  ;;  %v1290_v63 = vcvt.f32.s32 %v3604_v56 }
 0x398   : > { %v1510_v4 = vsel %vm1509_vm8, %v1505_v11, inf  ;;  %v1559_v56 = vand.u32 65535, %v3633_v38 }
 0x399   : > { %v1278_v36 = vadd.s32 %v1277_v17, %v1275_v58  ;;  %1511 = vmin.xlane.f32.xlu0 %v1510_v4  ;;  %v1291_v9 = vshll.u32 %v1290_v63, 16  ;;  %v1305_v17 = vshll.u32 %v1304_v15, 16  ;;  %v1573_v58 = vand.u32 65535, %v3647_v37 }
 0x39a   : > { %v3784_v21 = vpop.xlane.xlu1 %1521  ;;  %v3786_v3 = vpop.xlane.xlu0 %1535  ;;  %v1561_v41 = vcvt.s32.f32 %v1559_v56  ;;  %v1333_v4 = vshll.u32 %v1332_v25, 16  ;;  %v1601_v37 = vand.u32 65535, %v3671_v14  ;;  %v1615_v56 = vand.u32 65535, %v3686_v31 }
 0x39b   : > { %vm1523_vm9 = vcmp.eq.f32.partialorder %v3607_v5, %v3784_v21  ;;  %vm1674_vm11 = vcmp.eq.s32.totalorder %v3313_v8, %v1278_v36  ;;  %vm1537_vm13 = vcmp.eq.f32.partialorder %v3609_v40, %v3786_v3  ;;  %v1587_v36 = vand.u32 65535, %v3658_v48 }
 0x39c   : > { %v1524_v10 = vsel %vm1523_vm9, %v1519_v60, inf  ;;  %vm2497_vm12 = vmpackc.low %vm1674_vm11, %vm1673_vm10  ;;  %v1538_v20 = vsel %vm1537_vm13, %v1533_v28, inf  ;;  %v1575_v63 = vcvt.s32.f32 %v1573_v58  ;;  %v1617_v31 = vcvt.s32.f32 %v1615_v56 }
 0x39d   : > { %1525 = vmin.xlane.f32.xlu1 %v1524_v10  ;;  %2498 = vmatmul.mubr.msk.bf16.gmra.mxu1 %vm2497_vm12, %v2902_v32 }
 0x39e   : > { %1539 = vmin.xlane.f32.xlu0 %v1538_v20  ;;  %v3796_v44 = vpop.xlane.xlu1 %1549  ;;  %v1288_v5 = vpop.xlane.xlu0 %1287  ;;  %1943 = vmatprep.mubr.bf16.mxu1 %v2901_v22  ;;  %v1589_v20 = vcvt.s32.f32 %v1587_v36 }
 0x39f   : > { %v1289_v7 = vcvt.f32.s32 %v1288_v5  ;;  %vm1551_vm14 = vcmp.eq.f32.partialorder %v3630_v30, %v3796_v44  ;;  %v1319_v30 = vshll.u32 %v1318_v0, 16  ;;  %v1346_v5 = vcvt.f32.s32 %v3663_v2 }
 0x3a0   : > { %v1552_v40 = vsel %vm1551_vm14, %v1547_v62, inf  ;;  %v1360_v2 = vcvt.f32.s32 %v3680_v53  ;;  %v1388_v0 = vcvt.f32.s32 %v3702_v29 }
 0x3a1   : > { %1553 = vmin.xlane.f32.xlu1 %v1552_v40  ;;  %v1292_v13 = vadd.s32 %v1291_v9, %v1289_v7  ;;  %v1603_v7 = vcvt.s32.f32 %v1601_v37  ;;  %v1374_v9 = vcvt.f32.s32 %v3692_v19 }
 0x3a2   : > { %v1302_v52 = vpop.xlane.xlu1 %1301  ;;  %v1316_v47 = vpop.xlane.xlu0 %1315  ;;  %v1361_v53 = vshll.u32 %v1360_v2, 16  ;;  %v1389_v19 = vshll.u32 %v1388_v0, 16  ;;  %v1458_v0 = vcvt.f32.s32 %v3751_v12 }
 0x3a3   : > { %v1303_v11 = vcvt.f32.s32 %v1302_v52  ;;  %v1317_v6 = vcvt.f32.s32 %v1316_v47  ;;  %vm1675_vm15 = vcmp.eq.s32.totalorder %v3313_v8, %v1292_v13 }
 0x3a5   : > { %v1306_v16 = vadd.s32 %v1305_v17, %v1303_v11  ;;  %v1320_v1 = vadd.s32 %v1319_v30, %v1317_v6  ;;  %v1629_v6 = vand.u32 65535, %v3699_v42  ;;  %v1643_v42 = vand.u32 65535, %v3711_v45 }
 0x3a6   : > { %v1330_v38 = vpop.xlane.xlu1 %1329  ;;  %v3807_v18 = vpop.xlane.xlu0 %1563  ;;  %v1657_v45 = vand.u32 65535, %v3724_v51 }
 0x3a7   : > { %v1331_v27 = vcvt.f32.s32 %v1330_v38  ;;  %vm1676_vm0 = vcmp.eq.s32.totalorder %v3313_v8, %v1306_v16  ;;  %vm1565_vm1 = vcmp.eq.f32.partialorder %v3654_v55, %v3807_v18  ;;  %vm1677_vm5 = vcmp.eq.s32.totalorder %v3313_v8, %v1320_v1 }
 0x3a8   : > { %vm2499_vm2 = vmpackc.low %vm1676_vm0, %vm1675_vm15  ;;  %v1566_v60 = vsel %vm1565_vm1, %v1561_v41, inf  ;;  %v1416_v38 = vcvt.f32.s32 %v3728_v24 }
 0x3a9   : > { %v1334_v28 = vadd.s32 %v1333_v4, %v1331_v27  ;;  %2500 = vmatmul.mubr.msk.bf16.gmra.mxu1 %vm2499_vm2, %v2902_v32  ;;  %1567 = vmin.xlane.f32.xlu0 %v1566_v60  ;;  %v1402_v4 = vcvt.f32.s32 %v3715_v23  ;;  %v1631_v60 = vcvt.s32.f32 %v1629_v6 }
 0x3aa   : > { %v3815_v48 = vpop.xlane.xlu1 %1577  ;;  %v3817_v10 = vpop.xlane.xlu0 %1591  ;;  %1953 = vmatprep.mubr.bf16.mxu1 %v2901_v22 }
 0x3ab   : > { %vm1579_vm3 = vcmp.eq.f32.partialorder %v3666_v26, %v3815_v48  ;;  %vm1593_vm4 = vcmp.eq.f32.partialorder %v3668_v43, %v3817_v10  ;;  %vm1678_vm6 = vcmp.eq.s32.totalorder %v3313_v8, %v1334_v28  ;;  %v1347_v26 = vshll.u32 %v1346_v5, 16 }
 0x3ac   : > { %v1580_v55 = vsel %vm1579_vm3, %v1575_v63, inf  ;;  %v1594_v62 = vsel %vm1593_vm4, %v1589_v20, inf  ;;  %vm2501_vm7 = vmpackc.low %vm1678_vm6, %vm1677_vm5  ;;  %v1403_v23 = vshll.u32 %v1402_v4, 16  ;;  %v1645_v63 = vcvt.s32.f32 %v1643_v42 }
 0x3ad   : > { %1581 = vmin.xlane.f32.xlu1 %v1580_v55  ;;  %1595 = vmin.xlane.f32.xlu0 %v1594_v62  ;;  %v1417_v20 = vshll.u32 %v1416_v38, 16  ;;  %v1430_v62 = vcvt.f32.s32 %v3730_v50  ;;  %v1528_v42 = vcvt.f32.s32 %v3784_v21 }
 0x3ae   : > { %v3827_v14 = vpop.xlane.xlu1 %1605  ;;  %v1344_v15 = vpop.xlane.xlu0 %1343 }
 0x3af   : > { %v1345_v40 = vcvt.f32.s32 %v1344_v15  ;;  %vm1607_vm8 = vcmp.eq.f32.partialorder %v3683_v57, %v3827_v14  ;;  %v1375_v57 = vshll.u32 %v1374_v9, 16 }
 0x3b0   : > { %v1608_v43 = vsel %vm1607_vm8, %v1603_v7, inf  ;;  %v1444_v7 = vcvt.f32.s32 %v3741_v34 }
 0x3b1   : > { %1609 = vmin.xlane.f32.xlu1 %v1608_v43  ;;  %2502 = vmatmul.mubr.msk.bf16.gmra.mxu1 %vm2501_vm7, %v2902_v32  ;;  %v1348_v25 = vadd.s32 %v1347_v26, %v1345_v40  ;;  %v1659_v40 = vcvt.s32.f32 %v1657_v45 }
 0x3b2   : > { %v1358_v52 = vpop.xlane.xlu1 %1357  ;;  %v1372_v47 = vpop.xlane.xlu0 %1371  ;;  %1963 = vmatprep.mubr.bf16.mxu1 %v2901_v22  ;;  %v1445_v34 = vshll.u32 %v1444_v7, 16  ;;  %v1584_v7 = vcvt.f32.s32 %v3815_v48 }
 0x3b3   : > { %v1359_v17 = vcvt.f32.s32 %v1358_v52  ;;  %v1373_v13 = vcvt.f32.s32 %v1372_v47  ;;  %vm1679_vm9 = vcmp.eq.s32.totalorder %v3313_v8, %v1348_v25 }
 0x3b5   : > { %v1362_v11 = vadd.s32 %v1361_v53, %v1359_v17  ;;  %v1376_v29 = vadd.s32 %v1375_v57, %v1373_v13  ;;  %v1459_v53 = vshll.u32 %v1458_v0, 16 }
 0x3b6   : > { %v1386_v16 = vpop.xlane.xlu1 %1385  ;;  %v3838_v41 = vpop.xlane.xlu0 %1619 }
 0x3b7   : > { %v1387_v58 = vcvt.f32.s32 %v1386_v16  ;;  %vm1680_vm10 = vcmp.eq.s32.totalorder %v3313_v8, %v1362_v11  ;;  %vm1621_vm11 = vcmp.eq.f32.partialorder %v3707_v33, %v3838_v41  ;;  %vm1681_vm14 = vcmp.eq.s32.totalorder %v3313_v8, %v1376_v29 }
 0x3b8   : > { %vm2503_vm12 = vmpackc.low %vm1680_vm10, %vm1679_vm9  ;;  %v1622_v30 = vsel %vm1621_vm11, %v1617_v31, inf  ;;  %v1486_v16 = vcvt.f32.s32 %v3758_v61  ;;  %v1514_v61 = vcvt.f32.s32 %v3777_v49 }
 0x3b9   : > { %v1390_v36 = vadd.s32 %v1389_v19, %v1387_v58  ;;  %2504 = vmatmul.mubr.msk.bf16.gmra.mxu1 %vm2503_vm12, %v2902_v32  ;;  %1623 = vmin.xlane.f32.xlu0 %v1622_v30  ;;  %v1500_v19 = vcvt.f32.s32 %v3764_v35 }
 0x3ba   : > { %v3848_v27 = vpop.xlane.xlu1 %1633  ;;  %v1400_v1 = vpop.xlane.xlu0 %1399  ;;  %1973 = vmatprep.mubr.bf16.mxu1 %v2901_v22  ;;  %v1487_v30 = vshll.u32 %v1486_v16, 16 }
 0x3bb   : > { %v1401_v28 = vcvt.f32.s32 %v1400_v1  ;;  %vm1635_vm13 = vcmp.eq.f32.partialorder %v3718_v39, %v3848_v27  ;;  %vm1682_vm15 = vcmp.eq.s32.totalorder %v3313_v8, %v1390_v36  ;;  %v1501_v29 = vshll.u32 %v1500_v19, 16 }
 0x3bc   : > { %v1636_v33 = vsel %vm1635_vm13, %v1631_v60, inf  ;;  %vm2505_vm0 = vmpackc.low %vm1682_vm15, %vm1681_vm14  ;;  %v1515_v1 = vshll.u32 %v1514_v61, 16  ;;  %v1542_v60 = vcvt.f32.s32 %v3786_v3  ;;  %v1570_v3 = vcvt.f32.s32 %v3807_v18 }
 0x3bd   : > { %1637 = vmin.xlane.f32.xlu1 %v1636_v33  ;;  %v1404_v5 = vadd.s32 %v1403_v23, %v1401_v28  ;;  %v1556_v28 = vcvt.f32.s32 %v3796_v44  ;;  %v1529_v23 = vshll.u32 %v1528_v42, 16 }
 0x3be   : > { %v1414_v24 = vpop.xlane.xlu1 %1413  ;;  %v3856_v37 = vpop.xlane.xlu0 %1647 }
 0x3bf   : > { %v1415_v55 = vcvt.f32.s32 %v1414_v24  ;;  %vm1649_vm1 = vcmp.eq.f32.partialorder %v3734_v54, %v3856_v37  ;;  %vm1683_vm3 = vcmp.eq.s32.totalorder %v3313_v8, %v1404_v5  ;;  %v1431_v54 = vshll.u32 %v1430_v62, 16 }
 0x3c0   : > { %v1650_v39 = vsel %vm1649_vm1, %v1645_v63, inf  ;;  %v1543_v5 = vshll.u32 %v1542_v60, 16 }
 0x3c1   : > { %v1418_v15 = vadd.s32 %v1417_v20, %v1415_v55  ;;  %2506 = vmatmul.mubr.msk.bf16.gmra.mxu1 %vm2505_vm0, %v2902_v32  ;;  %1651 = vmin.xlane.f32.xlu0 %v1650_v39  ;;  %v1557_v39 = vshll.u32 %v1556_v28, 16 }
 0x3c2   : > { %v3863_v51 = vpop.xlane.xlu1 %1661  ;;  %v1428_v2 = vpop.xlane.xlu0 %1427  ;;  %1983 = vmatprep.mubr.bf16.mxu1 %v2901_v22 }
 0x3c3   : > { %v1429_v26 = vcvt.f32.s32 %v1428_v2  ;;  %vm1663_vm2 = vcmp.eq.f32.partialorder %v3743_v46, %v3863_v51  ;;  %vm1684_vm4 = vcmp.eq.s32.totalorder %v3313_v8, %v1418_v15  ;;  %v1472_v46 = vcvt.f32.s32 %v3756_v59 }
 0x3c4   : > { %v1664_v50 = vsel %vm1663_vm2, %v1659_v40, inf  ;;  %vm2507_vm5 = vmpackc.low %vm1684_vm4, %vm1683_vm3  ;;  %v1571_v40 = vshll.u32 %v1570_v3, 16 }
 0x3c5   : > { %1665 = vmin.xlane.f32.xlu1 %v1664_v50  ;;  %v1432_v9 = vadd.s32 %v1431_v54, %v1429_v26  ;;  %v1473_v13 = vshll.u32 %v1472_v46, 16  ;;  %v1598_v26 = vcvt.f32.s32 %v3817_v10  ;;  %v1612_v50 = vcvt.f32.s32 %v3827_v14 }
 0x3c6   : > { %v1442_v43 = vpop.xlane.xlu1 %1441  ;;  %v1626_v14 = vcvt.f32.s32 %v3838_v41 }
 0x3c7   : > { %v1443_v56 = vcvt.f32.s32 %v1442_v43  ;;  %vm1685_vm6 = vcmp.eq.s32.totalorder %v3313_v8, %v1432_v9  ;;  %v1599_v18 = vshll.u32 %v1598_v26, 16 }
 0x3c9   : > { %v1446_v25 = vadd.s32 %v1445_v34, %v1443_v56  ;;  %2508 = vmatmul.mubr.msk.bf16.gmra.mxu1 %vm2507_vm5, %v2902_v32  ;;  %v1585_v34 = vshll.u32 %v1584_v7, 16 }
 0x3ca   : > { %v1456_v52 = vpop.xlane.xlu0 %1455  ;;  %1993 = vmatprep.mubr.bf16.mxu1 %v2901_v22 }
 0x3cb   : > { %v1457_v47 = vcvt.f32.s32 %v1456_v52  ;;  %vm1686_vm7 = vcmp.eq.s32.totalorder %v3313_v8, %v1446_v25  ;;  %v1613_v52 = vshll.u32 %v1612_v50, 16 }
 0x3cc   : > { %vm2509_vm8 = vmpackc.low %vm1686_vm7, %vm1685_vm6 }
 0x3cd   : > { %v1460_v57 = vadd.s32 %v1459_v53, %v1457_v47 }
 0x3ce   : > { %v1470_v17 = vpop.xlane.xlu1 %1469  ;;  %v1484_v59 = vpop.xlane.xlu0 %1483 }
 0x3cf   : > { %v1471_v11 = vcvt.f32.s32 %v1470_v17  ;;  %vm1687_vm9 = vcmp.eq.s32.totalorder %v3313_v8, %v1460_v57  ;;  %v1485_v58 = vcvt.f32.s32 %v1484_v59  ;;  %v1640_v17 = vcvt.f32.s32 %v3848_v27 }
 0x3d0   : > { %v1627_v57 = vshll.u32 %v1626_v14, 16  ;;  %v1654_v59 = vcvt.f32.s32 %v3856_v37 }
 0x3d1   : > { %v1474_v12 = vadd.s32 %v1473_v13, %v1471_v11  ;;  %2510 = vmatmul.mubr.msk.bf16.gmra.mxu1 %vm2509_vm8, %v2902_v32  ;;  %v1488_v36 = vadd.s32 %v1487_v30, %v1485_v58  ;;  %v4045_v30 = vlaneseq }
 0x3d2   : > { %v1498_v6 = vpop.xlane.xlu1 %1497  ;;  %2003 = vmatprep.mubr.bf16.mxu1 %v2901_v22  ;;  %v1655_v27 = vshll.u32 %v1654_v59, 16 }
 0x3d3   : > { %vm1688_vm10 = vcmp.eq.s32.totalorder %v3313_v8, %v1474_v12  ;;  %v1499_v31 = vcvt.f32.s32 %v1498_v6  ;;  %vm1689_vm13 = vcmp.eq.s32.totalorder %v3313_v8, %v1488_v36  ;;  %v1641_v12 = vshll.u32 %v1640_v17, 16 }
 0x3d4   : > { %vm2511_vm11 = vmpackc.low %vm1688_vm10, %vm1687_vm9 }
 0x3d5   : > { %v1502_v4 = vadd.s32 %v1501_v29, %v1499_v31  ;;  %v1668_v29 = vcvt.f32.s32 %v3863_v51  ;;  %v1799_v51 = vld [vmem:[%s4042_s6] sm:$0x3] }
 0x3d7   : > { %vm1690_vm12 = vcmp.eq.s32.totalorder %v3313_v8, %v1502_v4  ;;  %v1802_v4 = vshrl.u32 %v4045_v30, 7  ;;  %v1669_v36 = vshll.u32 %v1668_v29, 16 }
 0x3d8   : > { %vm2513_vm14 = vmpackc.low %vm1690_vm12, %vm1689_vm13 }
 0x3d9   : > { %2512 = vmatmul.mubr.msk.bf16.gmra.mxu1 %vm2511_vm11, %v2902_v32  ;;  %v1803_v42 = vsub.s32 0, %v1802_v4 }
 0x3da   : > { %2013 = vmatprep.mubr.bf16.mxu1 %v2901_v22 }
 0x3e1   : > { %2514 = vmatmul.mubr.msk.bf16.gmra.mxu1 %vm2513_vm14, %v2902_v32 }
 0x3e2   : > { %2023 = vmatprep.mubr.bf16.mxu1 %v2901_v22 }
 0x422   : > { %v1512_v35 = vpop.xlane.xlu0 %1511 }
 0x423   : > { %v1513_v38 = vcvt.f32.s32 %v1512_v35 }
 0x425   : > { %v1516_v45 = vadd.s32 %v1515_v1, %v1513_v38  ;;  %v1807_v38 = vsub.s32 1, %v1802_v4 }
 0x426   : > { %v1526_v33 = vpop.xlane.xlu1 %1525 }
 0x427   : > { %v1527_v24 = vcvt.f32.s32 %v1526_v33  ;;  %v1540_v63 = vpop.xlane.xlu0 %1539  ;;  %vm1691_vm15 = vcmp.eq.s32.totalorder %v3313_v8, %v1516_v45  ;;  %v3929_v28 = vrot.slane %v1799_v51, %v1807_v38 }
 0x428   : > { %v1541_v20 = vcvt.f32.s32 %v1540_v63 }
 0x429   : > { %v1530_v55 = vadd.s32 %v1529_v23, %v1527_v24 }
 0x42a   : > { %v1554_v62 = vpop.xlane.xlu1 %1553  ;;  %v1544_v49 = vadd.s32 %v1543_v5, %v1541_v20 }
 0x42b   : > { %v1555_v15 = vcvt.f32.s32 %v1554_v62  ;;  %vm1692_vm0 = vcmp.eq.s32.totalorder %v3313_v8, %v1530_v55 }
 0x42c   : > { %vm2515_vm1 = vmpackc.low %vm1692_vm0, %vm1691_vm15  ;;  %vm1693_vm2 = vcmp.eq.s32.totalorder %v3313_v8, %v1544_v49 }
 0x42d   : > { %v1558_v21 = vadd.s32 %v1557_v39, %v1555_v15  ;;  %2516 = vmatmul.mubr.msk.bf16.gmra.mxu1 %vm2515_vm1, %v2902_v32 }
 0x42e   : > { %2033 = vmatprep.mubr.bf16.mxu1 %v2901_v22 }
 0x42f   : > { %vm1694_vm3 = vcmp.eq.s32.totalorder %v3313_v8, %v1558_v21 }
 0x430   : > { %vm2517_vm4 = vmpackc.low %vm1694_vm3, %vm1693_vm2 }
 0x432   : > { %v1568_v44 = vpop.xlane.xlu0 %1567 }
 0x433   : > { %v1569_v2 = vcvt.f32.s32 %v1568_v44 }
 0x435   : > { %2518 = vmatmul.mubr.msk.bf16.gmra.mxu1 %vm2517_vm4, %v2902_v32  ;;  %v1572_v9 = vadd.s32 %v1571_v40, %v1569_v2 }
 0x436   : > { %v1582_v54 = vpop.xlane.xlu1 %1581  ;;  %v1596_v43 = vpop.xlane.xlu0 %1595  ;;  %2043 = vmatprep.mubr.bf16.mxu1 %v2901_v22 }
 0x437   : > { %v1583_v56 = vcvt.f32.s32 %v1582_v54  ;;  %v1597_v0 = vcvt.f32.s32 %v1596_v43  ;;  %vm1695_vm5 = vcmp.eq.s32.totalorder %v3313_v8, %v1572_v9 }
 0x439   : > { %v1586_v25 = vadd.s32 %v1585_v34, %v1583_v56  ;;  %v1600_v46 = vadd.s32 %v1599_v18, %v1597_v0 }
 0x43a   : > { %v1610_v48 = vpop.xlane.xlu1 %1609 }
 0x43b   : > { %v1611_v47 = vcvt.f32.s32 %v1610_v48  ;;  %vm1696_vm6 = vcmp.eq.s32.totalorder %v3313_v8, %v1586_v25  ;;  %vm1697_vm8 = vcmp.eq.s32.totalorder %v3313_v8, %v1600_v46 }
 0x43c   : > { %vm2519_vm7 = vmpackc.low %vm1696_vm6, %vm1695_vm5 }
 0x43d   : > { %v1614_v10 = vadd.s32 %v1613_v52, %v1611_v47  ;;  %2520 = vmatmul.mubr.msk.bf16.gmra.mxu1 %vm2519_vm7, %v2902_v32 }
 0x43e   : > { %2053 = vmatprep.mubr.bf16.mxu1 %v2901_v22 }
 0x43f   : > { %vm1698_vm9 = vcmp.eq.s32.totalorder %v3313_v8, %v1614_v10 }
 0x440   : > { %vm2521_vm10 = vmpackc.low %vm1698_vm9, %vm1697_vm8 }
 0x442   : > { %v1624_v53 = vpop.xlane.xlu0 %1623 }
 0x443   : > { %v1625_v13 = vcvt.f32.s32 %v1624_v53 }
 0x445   : > { %2522 = vmatmul.mubr.msk.bf16.gmra.mxu1 %vm2521_vm10, %v2902_v32  ;;  %v1628_v6 = vadd.s32 %v1627_v57, %v1625_v13 }
 0x446   : > { %v1638_v11 = vpop.xlane.xlu1 %1637  ;;  %2063 = vmatprep.mubr.bf16.mxu1 %v2901_v22 }
 0x447   : > { %v1639_v19 = vcvt.f32.s32 %v1638_v11  ;;  %vm1699_vm11 = vcmp.eq.s32.totalorder %v3313_v8, %v1628_v6 }
 0x449   : > { %v1642_v16 = vadd.s32 %v1641_v12, %v1639_v19 }
 0x44a   : > { %v1652_v31 = vpop.xlane.xlu0 %1651 }
 0x44b   : > { %v1653_v41 = vcvt.f32.s32 %v1652_v31  ;;  %vm1700_vm12 = vcmp.eq.s32.totalorder %v3313_v8, %v1642_v16 }
 0x44c   : > { %vm2523_vm13 = vmpackc.low %vm1700_vm12, %vm1699_vm11 }
 0x44d   : > { %2524 = vmatmul.mubr.msk.bf16.gmra.mxu1 %vm2523_vm13, %v2902_v32  ;;  %v1656_v37 = vadd.s32 %v1655_v27, %v1653_v41 }
 0x44e   : > { %v1666_v58 = vpop.xlane.xlu1 %1665  ;;  %2073 = vmatprep.mubr.bf16.mxu1 %v2901_v22  ;;  %v3927_v22 = vrot.slane %v1799_v51, %v1803_v42 }
 0x44f   : > { %v1667_v61 = vcvt.f32.s32 %v1666_v58  ;;  %vm1701_vm14 = vcmp.eq.s32.totalorder %v3313_v8, %v1656_v37 }
 0x451   : > { %v1670_v35 = vadd.s32 %v1669_v36, %v1667_v61 }
 0x453   : > { %vm1702_vm15 = vcmp.eq.s32.totalorder %v3313_v8, %v1670_v35 }
 0x454   : > { %vm2525_vm0 = vmpackc.low %vm1702_vm15, %vm1701_vm14 }
 0x455   : > { %v1925_v1 = vpop.f32.mrf.mxu1  ;;  %2526 = vmatmul.mubr.msk.bf16.gmra.mxu1 %vm2525_vm0, %v2902_v32 }
 0x456   : > { %v1926_v23 = vadd.f32 %v1925_v1, %v3927_v22 }
 0x457   : > { %v1927_v60 = vpop.f32.mrf.mxu1 }
 0x458   : > { %v1928_v24 = vadd.f32 %v1927_v60, %v3929_v28 }
 0x459   : > { %v1929_v33 = vpop.f32.mrf.mxu1 }
 0x45a   : > { %v1930_v45 = vadd.f32 %v1929_v33, %v3927_v22 }
 0x45b   : > { %v1931_v8 = vpop.f32.mrf.mxu1 }
 0x45c   : > { %v2084_v63 = vpack.c.bf16 %v1930_v45, %v1926_v23  ;;  %v1932_v20 = vadd.f32 %v1931_v8, %v3929_v28 }
 0x45d   : > { %v1935_v5 = vpop.f32.mrf.mxu1 }
 0x45e   : > { %v2085_v55 = vpack.c.bf16 %v1932_v20, %v1928_v24  ;;  %2829 = vtanh.bf16 %v2084_v63  ;;  %v1936_v62 = vadd.f32 %v1935_v5, %v3927_v22 }
 0x45f   : > { %v1937_v32 = vpop.f32.mrf.mxu1 }
 0x460   : > { %2831 = vtanh.bf16 %v2085_v55  ;;  %v1938_v21 = vadd.f32 %v1937_v32, %v3929_v28 }
 0x461   : > { %v1939_v39 = vpop.f32.mrf.mxu1 }
 0x462   : > { %v1940_v49 = vadd.f32 %v1939_v39, %v3927_v22 }
 0x463   : > { %v1941_v15 = vpop.f32.mrf.mxu1 }
 0x464   : > { %v2086_v3 = vpack.c.bf16 %v1940_v49, %v1936_v62  ;;  %v1942_v44 = vadd.f32 %v1941_v15, %v3929_v28 }
 0x466   : > { %v2087_v7 = vpack.c.bf16 %v1942_v44, %v1938_v21  ;;  %2833 = vtanh.bf16 %v2086_v3 }
 0x468   : > { %2835 = vtanh.bf16 %v2087_v7 }
 0x469   : > { %v1945_v2 = vpop.f32.mrf.mxu1 }
 0x46a   : > { %v1946_v43 = vadd.f32 %v1945_v2, %v3927_v22 }
 0x46b   : > { %v1947_v40 = vpop.f32.mrf.mxu1 }
 0x46c   : > { %v2830_v26 = vpop.eup %2829  ;;  %v1948_v18 = vadd.f32 %v1947_v40, %v3929_v28 }
 0x46d   : > { %v1949_v50 = vpop.f32.mrf.mxu1 }
 0x46e   : > { %v2832_v54 = vpop.eup %2831  ;;  %v1950_v34 = vadd.f32 %v1949_v50, %v3927_v22 }
 0x46f   : > { %v2527_v9 = vcombine.low %v2830_v26, %v2832_v54  ;;  %v2528_v56 = vcombine.high %v2830_v26, %v2832_v54  ;;  %v1951_v0 = vpop.f32.mrf.mxu1 }
 0x470   : > { %v2088_v25 = vpack.c.bf16 %v1950_v34, %v1946_v43  ;;  %v1952_v52 = vadd.f32 %v1951_v0, %v3929_v28 }
 0x471   : > { %2308 = vst [vmem:[%s3943_s29] sm:$0xff] %v2527_v9  ;;  %2309 = vst [vmem:[%s3943_s29 + $0x8] sm:$0xff] %v2528_v56  ;;  %v1955_v48 = vpop.f32.mrf.mxu1 }
 0x472   : > { %v2089_v46 = vpack.c.bf16 %v1952_v52, %v1948_v18  ;;  %2837 = vtanh.bf16 %v2088_v25  ;;  %v1956_v17 = vadd.f32 %v1955_v48, %v3927_v22 }
 0x473   : > { %v1957_v47 = vpop.f32.mrf.mxu1 }
 0x474   : > { %2839 = vtanh.bf16 %v2089_v46  ;;  %v2834_v10 = vpop.eup %2833  ;;  %v1958_v6 = vadd.f32 %v1957_v47, %v3929_v28 }
 0x475   : > { %v1959_v14 = vpop.f32.mrf.mxu1 }
 0x476   : > { %v2836_v53 = vpop.eup %2835  ;;  %v1960_v13 = vadd.f32 %v1959_v14, %v3927_v22 }
 0x477   : > { %v2529_v57 = vcombine.low %v2834_v10, %v2836_v53  ;;  %v2530_v11 = vcombine.high %v2834_v10, %v2836_v53  ;;  %v1961_v12 = vpop.f32.mrf.mxu1 }
 0x478   : > { %v2090_v19 = vpack.c.bf16 %v1960_v13, %v1956_v17  ;;  %v1962_v59 = vadd.f32 %v1961_v12, %v3929_v28 }
 0x479   : > { %2310 = vst [vmem:[%s3943_s29 + $0x10] sm:$0xff] %v2529_v57  ;;  %2311 = vst [vmem:[%s3943_s29 + $0x18] sm:$0xff] %v2530_v11  ;;  %v1965_v16 = vpop.f32.mrf.mxu1 }
 0x47a   : > { %v2091_v31 = vpack.c.bf16 %v1962_v59, %v1958_v6  ;;  %2841 = vtanh.bf16 %v2090_v19  ;;  %v1966_v27 = vadd.f32 %v1965_v16, %v3927_v22 }
 0x47b   : > { %v1967_v29 = vpop.f32.mrf.mxu1 }
 0x47c   : > { %2843 = vtanh.bf16 %v2091_v31  ;;  %v1968_v4 = vadd.f32 %v1967_v29, %v3929_v28 }
 0x47d   : > { %v1969_v41 = vpop.f32.mrf.mxu1 }
 0x47e   : > { %v1970_v58 = vadd.f32 %v1969_v41, %v3927_v22 }
 0x47f   : > { %v1971_v30 = vpop.f32.mrf.mxu1 }
 0x480   : > { %v2092_v36 = vpack.c.bf16 %v1970_v58, %v1966_v27  ;;  %v1972_v37 = vadd.f32 %v1971_v30, %v3929_v28  ;;  %v2838_v61 = vpop.eup %2837 }
 0x481   : > { %v1975_v35 = vpop.f32.mrf.mxu1 }
 0x482   : > { %v2840_v42 = vpop.eup %2839  ;;  %v2093_v51 = vpack.c.bf16 %v1972_v37, %v1968_v4  ;;  %2845 = vtanh.bf16 %v2092_v36  ;;  %v1976_v23 = vadd.f32 %v1975_v35, %v3927_v22 }
 0x483   : > { %v2531_v38 = vcombine.low %v2838_v61, %v2840_v42  ;;  %v2532_v1 = vcombine.high %v2838_v61, %v2840_v42  ;;  %v1977_v60 = vpop.f32.mrf.mxu1 }
 0x484   : > { %2847 = vtanh.bf16 %v2093_v51  ;;  %v1978_v24 = vadd.f32 %v1977_v60, %v3929_v28 }
 0x485   : > { %2312 = vst [vmem:[%s3943_s29 + $0x20] sm:$0xff] %v2531_v38  ;;  %2313 = vst [vmem:[%s3943_s29 + $0x28] sm:$0xff] %v2532_v1  ;;  %v1979_v33 = vpop.f32.mrf.mxu1 }
 0x486   : > { %v1980_v45 = vadd.f32 %v1979_v33, %v3927_v22 }
 0x487   : > { %v1981_v8 = vpop.f32.mrf.mxu1 }
 0x488   : > { %v2094_v63 = vpack.c.bf16 %v1980_v45, %v1976_v23  ;;  %v1982_v20 = vadd.f32 %v1981_v8, %v3929_v28  ;;  %v2842_v5 = vpop.eup %2841 }
 0x489   : > { %v1985_v55 = vpop.f32.mrf.mxu1 }
 0x48a   : > { %v2844_v32 = vpop.eup %2843  ;;  %v2095_v39 = vpack.c.bf16 %v1982_v20, %v1978_v24  ;;  %2849 = vtanh.bf16 %v2094_v63  ;;  %v1986_v3 = vadd.f32 %v1985_v55, %v3927_v22 }
 0x48b   : > { %v2533_v62 = vcombine.low %v2842_v5, %v2844_v32  ;;  %v2534_v49 = vcombine.high %v2842_v5, %v2844_v32  ;;  %v1987_v15 = vpop.f32.mrf.mxu1 }
 0x48c   : > { %2851 = vtanh.bf16 %v2095_v39  ;;  %v1988_v2 = vadd.f32 %v1987_v15, %v3929_v28 }
 0x48d   : > { %2314 = vst [vmem:[%s3943_s29 + $0x30] sm:$0xff] %v2533_v62  ;;  %2315 = vst [vmem:[%s3943_s29 + $0x38] sm:$0xff] %v2534_v49  ;;  %v1989_v21 = vpop.f32.mrf.mxu1 }
 0x48e   : > { %v1990_v44 = vadd.f32 %v1989_v21, %v3927_v22 }
 0x48f   : > { %v1991_v7 = vpop.f32.mrf.mxu1 }
 0x490   : > { %v2096_v40 = vpack.c.bf16 %v1990_v44, %v1986_v3  ;;  %v1992_v26 = vadd.f32 %v1991_v7, %v3929_v28  ;;  %v2846_v50 = vpop.eup %2845 }
 0x491   : > { %v1995_v54 = vpop.f32.mrf.mxu1 }
 0x492   : > { %v2848_v43 = vpop.eup %2847  ;;  %v2097_v34 = vpack.c.bf16 %v1992_v26, %v1988_v2  ;;  %2853 = vtanh.bf16 %v2096_v40  ;;  %v1996_v25 = vadd.f32 %v1995_v54, %v3927_v22 }
 0x493   : > { %v2535_v9 = vcombine.low %v2846_v50, %v2848_v43  ;;  %v2536_v56 = vcombine.high %v2846_v50, %v2848_v43  ;;  %v1997_v0 = vpop.f32.mrf.mxu1 }
 0x494   : > { %2855 = vtanh.bf16 %v2097_v34  ;;  %v1998_v46 = vadd.f32 %v1997_v0, %v3929_v28 }
 0x495   : > { %2316 = vst [vmem:[%s3943_s29 + $0x40] sm:$0xff] %v2535_v9  ;;  %2317 = vst [vmem:[%s3943_s29 + $0x48] sm:$0xff] %v2536_v56  ;;  %v1999_v18 = vpop.f32.mrf.mxu1 }
 0x496   : > { %v2000_v52 = vadd.f32 %v1999_v18, %v3927_v22 }
 0x497   : > { %v2001_v48 = vpop.f32.mrf.mxu1 }
 0x498   : > { %v2098_v47 = vpack.c.bf16 %v2000_v52, %v1996_v25  ;;  %v2002_v10 = vadd.f32 %v2001_v48, %v3929_v28  ;;  %v2850_v14 = vpop.eup %2849 }
 0x499   : > { %v2005_v53 = vpop.f32.mrf.mxu1 }
 0x49a   : > { %v2852_v17 = vpop.eup %2851  ;;  %v2099_v13 = vpack.c.bf16 %v2002_v10, %v1998_v46  ;;  %2857 = vtanh.bf16 %v2098_v47  ;;  %v2006_v19 = vadd.f32 %v2005_v53, %v3927_v22 }
 0x49b   : > { %v2537_v57 = vcombine.low %v2850_v14, %v2852_v17  ;;  %v2538_v11 = vcombine.high %v2850_v14, %v2852_v17  ;;  %v2007_v12 = vpop.f32.mrf.mxu1 }
 0x49c   : > { %2859 = vtanh.bf16 %v2099_v13  ;;  %v2008_v31 = vadd.f32 %v2007_v12, %v3929_v28 }
 0x49d   : > { %2318 = vst [vmem:[%s3943_s29 + $0x50] sm:$0xff] %v2537_v57  ;;  %2319 = vst [vmem:[%s3943_s29 + $0x58] sm:$0xff] %v2538_v11  ;;  %v2009_v6 = vpop.f32.mrf.mxu1 }
 0x49e   : > { %v2010_v59 = vadd.f32 %v2009_v6, %v3927_v22 }
 0x49f   : > { %v2011_v16 = vpop.f32.mrf.mxu1 }
 0x4a0   : > { %v2100_v29 = vpack.c.bf16 %v2010_v59, %v2006_v19  ;;  %v2012_v41 = vadd.f32 %v2011_v16, %v3929_v28  ;;  %v2854_v27 = vpop.eup %2853 }
 0x4a1   : > { %v2015_v58 = vpop.f32.mrf.mxu1 }
 0x4a2   : > { %v2856_v30 = vpop.eup %2855  ;;  %v2101_v4 = vpack.c.bf16 %v2012_v41, %v2008_v31  ;;  %2861 = vtanh.bf16 %v2100_v29  ;;  %v2016_v42 = vadd.f32 %v2015_v58, %v3927_v22 }
 0x4a3   : > { %v2539_v36 = vcombine.low %v2854_v27, %v2856_v30  ;;  %v2540_v37 = vcombine.high %v2854_v27, %v2856_v30  ;;  %v2017_v61 = vpop.f32.mrf.mxu1 }
 0x4a4   : > { %2863 = vtanh.bf16 %v2101_v4  ;;  %v2018_v1 = vadd.f32 %v2017_v61, %v3929_v28 }
 0x4a5   : > { %2320 = vst [vmem:[%s3943_s29 + $0x60] sm:$0xff] %v2539_v36  ;;  %2321 = vst [vmem:[%s3943_s29 + $0x68] sm:$0xff] %v2540_v37  ;;  %v2019_v35 = vpop.f32.mrf.mxu1 }
 0x4a6   : > { %v2020_v51 = vadd.f32 %v2019_v35, %v3927_v22 }
 0x4a7   : > { %v2021_v38 = vpop.f32.mrf.mxu1 }
 0x4a8   : > { %v2102_v60 = vpack.c.bf16 %v2020_v51, %v2016_v42  ;;  %v2022_v33 = vadd.f32 %v2021_v38, %v3929_v28  ;;  %v2858_v23 = vpop.eup %2857 }
 0x4aa   : > { %v2860_v45 = vpop.eup %2859  ;;  %v2103_v8 = vpack.c.bf16 %v2022_v33, %v2018_v1  ;;  %2865 = vtanh.bf16 %v2102_v60 }
 0x4ab   : > { %v2541_v24 = vcombine.low %v2858_v23, %v2860_v45  ;;  %v2542_v63 = vcombine.high %v2858_v23, %v2860_v45 }
 0x4ac   : > { %2867 = vtanh.bf16 %v2103_v8 }
 0x4ad   : > { %2322 = vst [vmem:[%s3943_s29 + $0x70] sm:$0xff] %v2541_v24  ;;  %2323 = vst [vmem:[%s3943_s29 + $0x78] sm:$0xff] %v2542_v63 }
 0x4b0   : > { %v2862_v20 = vpop.eup %2861 }
 0x4b2   : > { %v2864_v5 = vpop.eup %2863 }
 0x4b3   : > { %v2543_v55 = vcombine.low %v2862_v20, %v2864_v5  ;;  %v2544_v32 = vcombine.high %v2862_v20, %v2864_v5 }
 0x4b5   : > { %2324 = vst [vmem:[%s3943_s29 + $0x80] sm:$0xff] %v2543_v55  ;;  %2325 = vst [vmem:[%s3943_s29 + $0x88] sm:$0xff] %v2544_v32 }
 0x4b8   : > { %v2866_v39 = vpop.eup %2865 }
 0x4ba   : > { %v2868_v62 = vpop.eup %2867 }
 0x4bb   : > { %v2545_v49 = vcombine.low %v2866_v39, %v2868_v62  ;;  %v2546_v15 = vcombine.high %v2866_v39, %v2868_v62 }
 0x4bd   : > { %2326 = vst [vmem:[%s3943_s29 + $0x90] sm:$0xff] %v2545_v49  ;;  %2327 = vst [vmem:[%s3943_s29 + $0x98] sm:$0xff] %v2546_v15 }
 0x4ed   : > { %v2025_v21 = vpop.f32.mrf.mxu1 }
 0x4ee   : > { %v2026_v7 = vadd.f32 %v2025_v21, %v3927_v22 }
 0x4ef   : > { %v2027_v3 = vpop.f32.mrf.mxu1 }
 0x4f0   : > { %v2028_v26 = vadd.f32 %v2027_v3, %v3929_v28 }
 0x4f1   : > { %v2029_v44 = vpop.f32.mrf.mxu1 }
 0x4f2   : > { %v2030_v2 = vadd.f32 %v2029_v44, %v3927_v22 }
 0x4f3   : > { %v2031_v40 = vpop.f32.mrf.mxu1 }
 0x4f4   : > { %v2104_v50 = vpack.c.bf16 %v2030_v2, %v2026_v7  ;;  %v2032_v54 = vadd.f32 %v2031_v40, %v3929_v28 }
 0x4f5   : > { %v2035_v43 = vpop.f32.mrf.mxu1 }
 0x4f6   : > { %v2105_v34 = vpack.c.bf16 %v2032_v54, %v2028_v26  ;;  %2869 = vtanh.bf16 %v2104_v50  ;;  %v2036_v0 = vadd.f32 %v2035_v43, %v3927_v22 }
 0x4f7   : > { %v2037_v9 = vpop.f32.mrf.mxu1 }
 0x4f8   : > { %2871 = vtanh.bf16 %v2105_v34  ;;  %v2038_v52 = vadd.f32 %v2037_v9, %v3929_v28 }
 0x4f9   : > { %v2039_v56 = vpop.f32.mrf.mxu1 }
 0x4fa   : > { %v2040_v18 = vadd.f32 %v2039_v56, %v3927_v22 }
 0x4fb   : > { %v2041_v25 = vpop.f32.mrf.mxu1 }
 0x4fc   : > { %v2106_v48 = vpack.c.bf16 %v2040_v18, %v2036_v0  ;;  %v2042_v46 = vadd.f32 %v2041_v25, %v3929_v28 }
 0x4fd   : > { %v2045_v47 = vpop.f32.mrf.mxu1 }
 0x4fe   : > { %v2107_v10 = vpack.c.bf16 %v2042_v46, %v2038_v52  ;;  %2873 = vtanh.bf16 %v2106_v48  ;;  %v2046_v17 = vadd.f32 %v2045_v47, %v3927_v22 }
 0x4ff   : > { %v2047_v14 = vpop.f32.mrf.mxu1 }
 0x500   : > { %2875 = vtanh.bf16 %v2107_v10  ;;  %v2048_v11 = vadd.f32 %v2047_v14, %v3929_v28 }
 0x501   : > { %v2049_v53 = vpop.f32.mrf.mxu1 }
 0x502   : > { %v2050_v13 = vadd.f32 %v2049_v53, %v3927_v22 }
 0x503   : > { %v2051_v57 = vpop.f32.mrf.mxu1 }
 0x504   : > { %v2108_v12 = vpack.c.bf16 %v2050_v13, %v2046_v17  ;;  %v2052_v6 = vadd.f32 %v2051_v57, %v3929_v28  ;;  %v2870_v19 = vpop.eup %2869 }
 0x505   : > { %v2055_v59 = vpop.f32.mrf.mxu1 }
 0x506   : > { %v2872_v16 = vpop.eup %2871  ;;  %v2109_v31 = vpack.c.bf16 %v2052_v6, %v2048_v11  ;;  %2877 = vtanh.bf16 %v2108_v12  ;;  %v2056_v30 = vadd.f32 %v2055_v59, %v3927_v22 }
 0x507   : > { %v2547_v29 = vcombine.low %v2870_v19, %v2872_v16  ;;  %v2548_v41 = vcombine.high %v2870_v19, %v2872_v16  ;;  %v2057_v27 = vpop.f32.mrf.mxu1 }
 0x508   : > { %2879 = vtanh.bf16 %v2109_v31  ;;  %v2058_v37 = vadd.f32 %v2057_v27, %v3929_v28 }
 0x509   : > { %2328 = vst [vmem:[%s3943_s29 + $0xa0] sm:$0xff] %v2547_v29  ;;  %2329 = vst [vmem:[%s3943_s29 + $0xa8] sm:$0xff] %v2548_v41  ;;  %v2059_v58 = vpop.f32.mrf.mxu1 }
 0x50a   : > { %v2060_v4 = vadd.f32 %v2059_v58, %v3927_v22 }
 0x50b   : > { %v2061_v36 = vpop.f32.mrf.mxu1 }
 0x50c   : > { %v2110_v61 = vpack.c.bf16 %v2060_v4, %v2056_v30  ;;  %v2062_v35 = vadd.f32 %v2061_v36, %v3929_v28  ;;  %v2874_v42 = vpop.eup %2873 }
 0x50d   : > { %v2065_v51 = vpop.f32.mrf.mxu1 }
 0x50e   : > { %v2876_v38 = vpop.eup %2875  ;;  %v2111_v1 = vpack.c.bf16 %v2062_v35, %v2058_v37  ;;  %2881 = vtanh.bf16 %v2110_v61  ;;  %v2066_v8 = vadd.f32 %v2065_v51, %v3927_v22 }
 0x50f   : > { %v2549_v60 = vcombine.low %v2874_v42, %v2876_v38  ;;  %v2550_v33 = vcombine.high %v2874_v42, %v2876_v38  ;;  %v2067_v23 = vpop.f32.mrf.mxu1 }
 0x510   : > { %2883 = vtanh.bf16 %v2111_v1  ;;  %v2068_v20 = vadd.f32 %v2067_v23, %v3929_v28 }
 0x511   : > { %2330 = vst [vmem:[%s3943_s29 + $0xb0] sm:$0xff] %v2549_v60  ;;  %2331 = vst [vmem:[%s3943_s29 + $0xb8] sm:$0xff] %v2550_v33  ;;  %v2069_v45 = vpop.f32.mrf.mxu1 }
 0x512   : > { %v2070_v24 = vadd.f32 %v2069_v45, %v3927_v22 }
 0x513   : > { %v2071_v63 = vpop.f32.mrf.mxu1 }
 0x514   : > { %v2112_v5 = vpack.c.bf16 %v2070_v24, %v2066_v8  ;;  %v2072_v55 = vadd.f32 %v2071_v63, %v3929_v28  ;;  %v2878_v32 = vpop.eup %2877 }
 0x515   : > { %v2075_v39 = vpop.f32.mrf.mxu1 }
 0x516   : > { %v2880_v62 = vpop.eup %2879  ;;  %v2113_v49 = vpack.c.bf16 %v2072_v55, %v2068_v20  ;;  %2885 = vtanh.bf16 %v2112_v5  ;;  %v2076_v7 = vadd.f32 %v2075_v39, %v3927_v22 }
 0x517   : > { %v2551_v15 = vcombine.low %v2878_v32, %v2880_v62  ;;  %v2552_v21 = vcombine.high %v2878_v32, %v2880_v62  ;;  %v2077_v3 = vpop.f32.mrf.mxu1 }
 0x518   : > { %2887 = vtanh.bf16 %v2113_v49  ;;  %v2078_v26 = vadd.f32 %v2077_v3, %v3929_v28 }
 0x519   : > { %2332 = vst [vmem:[%s3943_s29 + $0xc0] sm:$0xff] %v2551_v15  ;;  %2333 = vst [vmem:[%s3943_s29 + $0xc8] sm:$0xff] %v2552_v21  ;;  %v2079_v44 = vpop.f32.mrf.mxu1 }
 0x51a   : > { %v2080_v2 = vadd.f32 %v2079_v44, %v3927_v22 }
 0x51b   : > { %v2081_v40 = vpop.f32.mrf.mxu1 }
 0x51c   : > { %v2114_v50 = vpack.c.bf16 %v2080_v2, %v2076_v7  ;;  %v2082_v54 = vadd.f32 %v2081_v40, %v3929_v28  ;;  %v2882_v43 = vpop.eup %2881 }
 0x51e   : > { %v2884_v34 = vpop.eup %2883  ;;  %v2115_v9 = vpack.c.bf16 %v2082_v54, %v2078_v26  ;;  %2889 = vtanh.bf16 %v2114_v50 }
 0x51f   : > { %v2553_v56 = vcombine.low %v2882_v43, %v2884_v34  ;;  %v2554_v0 = vcombine.high %v2882_v43, %v2884_v34 }
 0x520   : > { %2891 = vtanh.bf16 %v2115_v9 }
 0x521   : > { %2334 = vst [vmem:[%s3943_s29 + $0xd0] sm:$0xff] %v2553_v56  ;;  %2335 = vst [vmem:[%s3943_s29 + $0xd8] sm:$0xff] %v2554_v0 }
 0x524   : > { %v2886_v22 = vpop.eup %2885 }
 0x526   : > { %v2888_v18 = vpop.eup %2887 }
 0x527   : > { %v2555_v25 = vcombine.low %v2886_v22, %v2888_v18  ;;  %v2556_v52 = vcombine.high %v2886_v22, %v2888_v18 }
 0x529   : > { %2336 = vst [vmem:[%s3943_s29 + $0xe0] sm:$0xff] %v2555_v25  ;;  %2337 = vst [vmem:[%s3943_s29 + $0xe8] sm:$0xff] %v2556_v52 }
 0x52c   : > { %v2890_v48 = vpop.eup %2889 }
 0x52e   : > { %v2892_v46 = vpop.eup %2891 }
 0x52f   : > { %v2557_v28 = vcombine.low %v2890_v48, %v2892_v46  ;;  %v2558_v47 = vcombine.high %v2890_v48, %v2892_v46 }
 0x531   : > { %2338 = vst [vmem:[%s3943_s29 + $0xf0] sm:$0xff] %v2557_v28  ;;  %2339 = vst [vmem:[%s3943_s29 + $0xf8] sm:$0xff] %v2558_v47 }
 0x532 PF: > { %s17_s24 = sadd.s32 1, %s2899_s24  }
 0x533   : > { %p14_p4 = scmp.ge.s32.totalorder %s17_s24, 4  }
 0x535   :  { %16 = sbr.rel (!%p14_p4) target bundleno = 1 (0x1), region = 78 }

</bundles_post_ra>
